<compile_context>
chip_gen: v6e
topology: v6e:2x2x1
jax: 0.10.0
libtpu: 0.0.40
codegen_flags: <defaults>
</compile_context>

<pallas_src>
import jax
import jax.numpy as jnp
from jax import lax
from jax.experimental import pallas as pl
from jax.experimental.pallas import tpu as pltpu

D = 32            # input feature dim "d" from the reference module
HIDDEN = 70       # logical hidden width of the PyTorch model
H_PAD = 128       # lane-aligned padded width
BATCH = 32

# layer sizes: d -> 70 -> 70 -> 70 -> 70 -> 70 -> 70 -> 1
LAYER_DIMS = [(D, HIDDEN)] + [(HIDDEN, HIDDEN)] * 5 + [(HIDDEN, 1)]
NUM_LAYERS = len(LAYER_DIMS)        # 7
NUM_HIDDEN = NUM_LAYERS - 2         # 5 hidden 70x70 layers (padded to 128x128)


# ----------------------------------------------------------------------------
# Kernel: full 7-layer MLP fused, one batch tile per grid step.
# ----------------------------------------------------------------------------
def mlp_kernel(x_ref, w0_ref, wr_ref, wlast_ref, b_ref, out_ref):
    # Layer 0: (TILE_B, D) @ (D, 128) in f32 (tiny K=32; keeps input mantissa).
    w0 = w0_ref[...]                                   # (D, 128) f32
    x = x_ref[...]                                     # (TILE_B, D)
    h = jnp.dot(x.astype(w0.dtype), w0, preferred_element_type=jnp.float32)
    h = h + b_ref[0]                                   # (1, 128) f32 broadcast
    h = jnp.maximum(h, 0.0)

    # Layers 1..5: 128x128 MXU matmuls (bf16 inputs, f32 accumulation).
    for layer in range(1, NUM_LAYERS - 1):
        w = wr_ref[layer - 1]                          # (128, 128)
        h = jnp.dot(h.astype(w.dtype), w, preferred_element_type=jnp.float32)
        h = h + b_ref[layer]
        h = jnp.maximum(h, 0.0)

    # Final 128 -> 1 layer: VPU multiply + lane reduction (no padded matmul,
    # no padded output writeback). Padded lanes of h and w_last are exactly 0.
    w_last = wlast_ref[...]                            # (1, 128) f32
    b_last = b_ref[NUM_LAYERS - 1]                     # (1, 128); only col 0 used
    out = jnp.sum(h * w_last, axis=-1, keepdims=True)  # (TILE_B, 1)
    out = out + b_last[:, :1]                          # (1, 1) broadcast
    out_ref[...] = out.astype(out_ref.dtype)


# ----------------------------------------------------------------------------
# Parameter init (PyTorch-Linear-style uniform +/- 1/sqrt(fan_in)) + packing.
# ----------------------------------------------------------------------------
def init_params(key):
    params = []
    for (fan_in, fan_out) in LAYER_DIMS:
        key, kw, kb = jax.random.split(key, 3)
        bound = 1.0 / jnp.sqrt(jnp.float32(fan_in))
        w = jax.random.uniform(kw, (fan_in, fan_out), jnp.float32, -bound, bound)
        b = jax.random.uniform(kb, (fan_out,), jnp.float32, -bound, bound)
        params.append((w, b))
    return params


def pack_params(params, hidden_dtype=jnp.bfloat16):
    """Zero-pad to 128 wide and stack into resident VMEM slabs.

    Returns (w0, wr, wlast, b):
      w0    : (D, 128)          f32   first layer
      wr    : (5, 128, 128)     hidden_dtype (bf16 by default, all generations)
      wlast : (1, 128)          f32   final layer as a row vector (VPU reduce)
      b     : (7, 1, 128)       f32   all biases (last layer bias in column 0)
    """
    w0, b0 = params[0]
    w0_p = jnp.zeros((D, H_PAD), jnp.float32).at[:, :HIDDEN].set(w0)

    wr_p = jnp.zeros((NUM_HIDDEN, H_PAD, H_PAD), jnp.float32)
    b_p = jnp.zeros((NUM_LAYERS, 1, H_PAD), jnp.float32)
    b_p = b_p.at[0, 0, :HIDDEN].set(b0)
    for layer in range(1, NUM_LAYERS - 1):
        w, b = params[layer]
        wr_p = wr_p.at[layer - 1, :HIDDEN, :HIDDEN].set(w)
        b_p = b_p.at[layer, 0, :HIDDEN].set(b)

    w_last, b_last = params[NUM_LAYERS - 1]            # (70, 1), (1,)
    wlast_p = jnp.zeros((1, H_PAD), jnp.float32).at[0, :HIDDEN].set(w_last[:, 0])
    b_p = b_p.at[NUM_LAYERS - 1, 0, 0].set(b_last[0])

    return w0_p, wr_p.astype(hidden_dtype), wlast_p, b_p


# ----------------------------------------------------------------------------
# Wrapper
# ----------------------------------------------------------------------------
def _const_spec(shape, single_buffer):
    """BlockSpec for a grid-resident (constant index_map) parameter slab."""
    nd = len(shape)
    idx = lambda i: (0,) * nd
    if single_buffer and hasattr(pl, "Buffered"):
        # Constant index_map -> the second pipeline buffer is dead weight.
        return pl.BlockSpec(shape, idx, pipeline_mode=pl.Buffered(1))
    return pl.BlockSpec(shape, idx)


def mlp_forward(x, w0, wr, wlast, b, *, tile_b=2048):
    batch = x.shape[0]
    # Sublane-aligned batch tile, large by default to amortize per-step cost...
    tb = max(8, min(tile_b, ((batch + 7) // 8) * 8))
    # ...but keep >= 2 grid steps when batch allows, so ("parallel",) can shard
    # the batch across the two v7x TensorCores.
    half = max(8, ((pl.cdiv(batch, 2) + 7) // 8) * 8)
    tb = min(tb, half)
    grid = (pl.cdiv(batch, tb),)

    def run(single_buffer):
        return pl.pallas_call(
            mlp_kernel,
            out_shape=jax.ShapeDtypeStruct((batch, 1), jnp.float32),
            grid=grid,
            in_specs=[
                pl.BlockSpec((tb, D), lambda i: (i, 0)),               # x tile
                _const_spec((D, H_PAD), single_buffer),                # w0
                _const_spec((NUM_HIDDEN, H_PAD, H_PAD), single_buffer),# wr
                _const_spec((1, H_PAD), single_buffer),                # w_last
                _const_spec((NUM_LAYERS, 1, H_PAD), single_buffer),    # biases
            ],
            out_specs=pl.BlockSpec((tb, 1), lambda i: (i, 0)),         # (batch,1)
            compiler_params=pltpu.CompilerParams(
                dimension_semantics=("parallel",)),
        )(x, w0, wr, wlast, b)

    try:
        return run(True)
    except Exception:
        # Fallback if this JAX build rejects pipeline_mode on pallas_call specs.
        return run(False)


# ----------------------------------------------------------------------------
# Pure-JAX references
# ----------------------------------------------------------------------------
def ref_forward_unpadded(x, params):
    """The original f32 PyTorch model math."""
    h = x
    for i, (w, b) in enumerate(params):
        h = jnp.dot(h, w, precision=lax.Precision.HIGHEST) + b
        if i < NUM_LAYERS - 1:
            h = jnp.maximum(h, 0.0)
    return h


def ref_forward_packed(x, w0, wr, wlast, b):
    """Mirrors the kernel math exactly (same dtypes, f32 accumulation)."""
    h = jnp.dot(x.astype(w0.dtype), w0, preferred_element_type=jnp.float32) + b[0]
    h = jnp.maximum(h, 0.0)
    for layer in range(1, NUM_LAYERS - 1):
        w = wr[layer - 1]
        h = jnp.dot(h.astype(w.dtype), w, preferred_element_type=jnp.float32)
        h = h + b[layer]
        h = jnp.maximum(h, 0.0)
    out = jnp.sum(h * wlast, axis=-1, keepdims=True) + b[NUM_LAYERS - 1, :, :1]
    return out


if __name__ == "__main__":
    key = jax.random.PRNGKey(0)
    key, kx = jax.random.split(key)
    x = jax.random.normal(kx, (BATCH, D), dtype=jnp.float32)
    params = init_params(key)

    # ---- all-f32 packing (tile_b=8 -> multi-step pipelined grid) vs original ----
    w0f, wrf, wlf, bf = pack_params(params, hidden_dtype=jnp.float32)
    out_f32 = jax.block_until_ready(mlp_forward(x, w0f, wrf, wlf, bf, tile_b=8))
    ref_f32 = jax.block_until_ready(ref_forward_unpadded(x, params))
    assert out_f32.shape == (BATCH, 1)
    err = float(jnp.max(jnp.abs(out_f32 - ref_f32)))
    assert err < 1e-3, err

    # ---- default path: bf16 hidden layers (used on v5e/v6e/v7x alike) ----
    w0b, wrb, wlb, bb = pack_params(params)   # hidden_dtype=bf16
    out_bf16 = jax.block_until_ready(mlp_forward(x, w0b, wrb, wlb, bb))
    ref_bf16 = jax.block_until_ready(ref_forward_packed(x, w0b, wrb, wlb, bb))
    assert out_bf16.shape == (BATCH, 1)
    err = float(jnp.max(jnp.abs(out_bf16 - ref_bf16)))
    assert err < 2e-2, err

    print("KERNEL_OK")
</pallas_src>

<mosaic_0001>
module attributes {stable_mosaic.version = 11 : i64} {
  func.func @mlp_kernel(%arg0: i32, %arg1: memref<8x32xf32, #tpu.memory_space<vmem>>, %arg2: memref<32x128xf32, #tpu.memory_space<vmem>>, %arg3: memref<5x128x128xf32, #tpu.memory_space<vmem>>, %arg4: memref<1x128xf32, #tpu.memory_space<vmem>>, %arg5: memref<7x1x128xf32, #tpu.memory_space<vmem>>, %arg6: memref<8x1xf32, #tpu.memory_space<vmem>>) attributes {dimension_semantics = [#tpu.dimension_semantics<parallel>], iteration_bounds = array<i64: 4>, scalar_prefetch = 0 : i64, scratch_operands = 0 : i64, tpu.core_type = #tpu.core_type<tc>, window_params = [{transform_indices = @transform_0, window_bounds = array<i64: 8, 32>}, {pipeline_mode = #tpu.pipeline_mode<synchronous>, transform_indices = @transform_1, window_bounds = array<i64: 32, 128>}, {pipeline_mode = #tpu.pipeline_mode<synchronous>, transform_indices = @transform_2, window_bounds = array<i64: 5, 128, 128>}, {pipeline_mode = #tpu.pipeline_mode<synchronous>, transform_indices = @transform_3, window_bounds = array<i64: 1, 128>}, {pipeline_mode = #tpu.pipeline_mode<synchronous>, transform_indices = @transform_4, window_bounds = array<i64: 7, 1, 128>}, {transform_indices = @transform_5, window_bounds = array<i64: 8, 1>}]} {
    %c0 = arith.constant 0 : index
    %c0_0 = arith.constant 0 : index
    %0 = vector.load %arg2[%c0, %c0_0] : memref<32x128xf32, #tpu.memory_space<vmem>>, vector<32x128xf32>
    %c0_1 = arith.constant 0 : index
    %c0_2 = arith.constant 0 : index
    %1 = vector.load %arg1[%c0_1, %c0_2] : memref<8x32xf32, #tpu.memory_space<vmem>>, vector<8x32xf32>
    %cst = arith.constant dense<0.000000e+00> : vector<8x128xf32>
    %2 = tpu.matmul %1, %0, %cst {dimension_numbers = #tpu.dot_dimension_numbers<[1], [0], [0], [1], [0, 0, 1, 1], [], []>} : vector<8x32xf32>, vector<32x128xf32>, vector<8x128xf32> -> vector<8x128xf32>
    %c0_3 = arith.constant 0 : index
    %c0_4 = arith.constant 0 : index
    %c0_5 = arith.constant 0 : index
    %3 = vector.load %arg5[%c0_3, %c0_4, %c0_5] : memref<7x1x128xf32, #tpu.memory_space<vmem>>, vector<1x1x128xf32>
    %4 = vector.shape_cast %3 : vector<1x1x128xf32> to vector<1x128xf32>
    %5 = vector.broadcast %4 : vector<1x128xf32> to vector<8x128xf32>
    %6 = arith.addf %2, %5 : vector<8x128xf32>
    %cst_6 = arith.constant 0.000000e+00 : f32
    %7 = vector.broadcast %cst_6 : f32 to vector<8x128xf32>
    %8 = arith.maximumf %6, %7 : vector<8x128xf32>
    %c0_7 = arith.constant 0 : index
    %c0_8 = arith.constant 0 : index
    %c0_9 = arith.constant 0 : index
    %9 = vector.load %arg3[%c0_7, %c0_8, %c0_9] : memref<5x128x128xf32, #tpu.memory_space<vmem>>, vector<1x128x128xf32>
    %10 = vector.shape_cast %9 : vector<1x128x128xf32> to vector<128x128xf32>
    %cst_10 = arith.constant dense<0.000000e+00> : vector<8x128xf32>
    %11 = tpu.matmul %8, %10, %cst_10 {dimension_numbers = #tpu.dot_dimension_numbers<[1], [0], [0], [1], [0, 0, 1, 1], [], []>} : vector<8x128xf32>, vector<128x128xf32>, vector<8x128xf32> -> vector<8x128xf32>
    %c1 = arith.constant 1 : index
    %c0_11 = arith.constant 0 : index
    %c0_12 = arith.constant 0 : index
    %12 = vector.load %arg5[%c1, %c0_11, %c0_12] : memref<7x1x128xf32, #tpu.memory_space<vmem>>, vector<1x1x128xf32>
    %13 = vector.shape_cast %12 : vector<1x1x128xf32> to vector<1x128xf32>
    %14 = vector.broadcast %13 : vector<1x128xf32> to vector<8x128xf32>
    %15 = arith.addf %11, %14 : vector<8x128xf32>
    %cst_13 = arith.constant 0.000000e+00 : f32
    %16 = vector.broadcast %cst_13 : f32 to vector<8x128xf32>
    %17 = arith.maximumf %15, %16 : vector<8x128xf32>
    %c1_14 = arith.constant 1 : index
    %c0_15 = arith.constant 0 : index
    %c0_16 = arith.constant 0 : index
    %18 = vector.load %arg3[%c1_14, %c0_15, %c0_16] : memref<5x128x128xf32, #tpu.memory_space<vmem>>, vector<1x128x128xf32>
    %19 = vector.shape_cast %18 : vector<1x128x128xf32> to vector<128x128xf32>
    %cst_17 = arith.constant dense<0.000000e+00> : vector<8x128xf32>
    %20 = tpu.matmul %17, %19, %cst_17 {dimension_numbers = #tpu.dot_dimension_numbers<[1], [0], [0], [1], [0, 0, 1, 1], [], []>} : vector<8x128xf32>, vector<128x128xf32>, vector<8x128xf32> -> vector<8x128xf32>
    %c2 = arith.constant 2 : index
    %c0_18 = arith.constant 0 : index
    %c0_19 = arith.constant 0 : index
    %21 = vector.load %arg5[%c2, %c0_18, %c0_19] : memref<7x1x128xf32, #tpu.memory_space<vmem>>, vector<1x1x128xf32>
    %22 = vector.shape_cast %21 : vector<1x1x128xf32> to vector<1x128xf32>
    %23 = vector.broadcast %22 : vector<1x128xf32> to vector<8x128xf32>
    %24 = arith.addf %20, %23 : vector<8x128xf32>
    %cst_20 = arith.constant 0.000000e+00 : f32
    %25 = vector.broadcast %cst_20 : f32 to vector<8x128xf32>
    %26 = arith.maximumf %24, %25 : vector<8x128xf32>
    %c2_21 = arith.constant 2 : index
    %c0_22 = arith.constant 0 : index
    %c0_23 = arith.constant 0 : index
    %27 = vector.load %arg3[%c2_21, %c0_22, %c0_23] : memref<5x128x128xf32, #tpu.memory_space<vmem>>, vector<1x128x128xf32>
    %28 = vector.shape_cast %27 : vector<1x128x128xf32> to vector<128x128xf32>
    %cst_24 = arith.constant dense<0.000000e+00> : vector<8x128xf32>
    %29 = tpu.matmul %26, %28, %cst_24 {dimension_numbers = #tpu.dot_dimension_numbers<[1], [0], [0], [1], [0, 0, 1, 1], [], []>} : vector<8x128xf32>, vector<128x128xf32>, vector<8x128xf32> -> vector<8x128xf32>
    %c3 = arith.constant 3 : index
    %c0_25 = arith.constant 0 : index
    %c0_26 = arith.constant 0 : index
    %30 = vector.load %arg5[%c3, %c0_25, %c0_26] : memref<7x1x128xf32, #tpu.memory_space<vmem>>, vector<1x1x128xf32>
    %31 = vector.shape_cast %30 : vector<1x1x128xf32> to vector<1x128xf32>
    %32 = vector.broadcast %31 : vector<1x128xf32> to vector<8x128xf32>
    %33 = arith.addf %29, %32 : vector<8x128xf32>
    %cst_27 = arith.constant 0.000000e+00 : f32
    %34 = vector.broadcast %cst_27 : f32 to vector<8x128xf32>
    %35 = arith.maximumf %33, %34 : vector<8x128xf32>
    %c3_28 = arith.constant 3 : index
    %c0_29 = arith.constant 0 : index
    %c0_30 = arith.constant 0 : index
    %36 = vector.load %arg3[%c3_28, %c0_29, %c0_30] : memref<5x128x128xf32, #tpu.memory_space<vmem>>, vector<1x128x128xf32>
    %37 = vector.shape_cast %36 : vector<1x128x128xf32> to vector<128x128xf32>
    %cst_31 = arith.constant dense<0.000000e+00> : vector<8x128xf32>
    %38 = tpu.matmul %35, %37, %cst_31 {dimension_numbers = #tpu.dot_dimension_numbers<[1], [0], [0], [1], [0, 0, 1, 1], [], []>} : vector<8x128xf32>, vector<128x128xf32>, vector<8x128xf32> -> vector<8x128xf32>
    %c4 = arith.constant 4 : index
    %c0_32 = arith.constant 0 : index
    %c0_33 = arith.constant 0 : index
    %39 = vector.load %arg5[%c4, %c0_32, %c0_33] : memref<7x1x128xf32, #tpu.memory_space<vmem>>, vector<1x1x128xf32>
    %40 = vector.shape_cast %39 : vector<1x1x128xf32> to vector<1x128xf32>
    %41 = vector.broadcast %40 : vector<1x128xf32> to vector<8x128xf32>
    %42 = arith.addf %38, %41 : vector<8x128xf32>
    %cst_34 = arith.constant 0.000000e+00 : f32
    %43 = vector.broadcast %cst_34 : f32 to vector<8x128xf32>
    %44 = arith.maximumf %42, %43 : vector<8x128xf32>
    %c4_35 = arith.constant 4 : index
    %c0_36 = arith.constant 0 : index
    %c0_37 = arith.constant 0 : index
    %45 = vector.load %arg3[%c4_35, %c0_36, %c0_37] : memref<5x128x128xf32, #tpu.memory_space<vmem>>, vector<1x128x128xf32>
    %46 = vector.shape_cast %45 : vector<1x128x128xf32> to vector<128x128xf32>
    %cst_38 = arith.constant dense<0.000000e+00> : vector<8x128xf32>
    %47 = tpu.matmul %44, %46, %cst_38 {dimension_numbers = #tpu.dot_dimension_numbers<[1], [0], [0], [1], [0, 0, 1, 1], [], []>} : vector<8x128xf32>, vector<128x128xf32>, vector<8x128xf32> -> vector<8x128xf32>
    %c5 = arith.constant 5 : index
    %c0_39 = arith.constant 0 : index
    %c0_40 = arith.constant 0 : index
    %48 = vector.load %arg5[%c5, %c0_39, %c0_40] : memref<7x1x128xf32, #tpu.memory_space<vmem>>, vector<1x1x128xf32>
    %49 = vector.shape_cast %48 : vector<1x1x128xf32> to vector<1x128xf32>
    %50 = vector.broadcast %49 : vector<1x128xf32> to vector<8x128xf32>
    %51 = arith.addf %47, %50 : vector<8x128xf32>
    %cst_41 = arith.constant 0.000000e+00 : f32
    %52 = vector.broadcast %cst_41 : f32 to vector<8x128xf32>
    %53 = arith.maximumf %51, %52 : vector<8x128xf32>
    %c0_42 = arith.constant 0 : index
    %c0_43 = arith.constant 0 : index
    %54 = vector.load %arg4[%c0_42, %c0_43] : memref<1x128xf32, #tpu.memory_space<vmem>>, vector<1x128xf32>
    %c6 = arith.constant 6 : index
    %c0_44 = arith.constant 0 : index
    %c0_45 = arith.constant 0 : index
    %55 = vector.load %arg5[%c6, %c0_44, %c0_45] : memref<7x1x128xf32, #tpu.memory_space<vmem>>, vector<1x1x128xf32>
    %56 = vector.shape_cast %55 : vector<1x1x128xf32> to vector<1x128xf32>
    %57 = vector.broadcast %54 : vector<1x128xf32> to vector<8x128xf32>
    %58 = arith.mulf %53, %57 : vector<8x128xf32>
    %cst_46 = arith.constant dense<0.000000e+00> : vector<8xf32>
    %59 = vector.multi_reduction <add>, %58, %cst_46 [1] : vector<8x128xf32> to vector<8xf32>
    %60 = vector.shape_cast %59 : vector<8xf32> to vector<8x1xf32>
    %61 = vector.extract_strided_slice %56 {offsets = [0, 0], sizes = [1, 1], strides = [1, 1]} : vector<1x128xf32> to vector<1x1xf32>
    %62 = vector.broadcast %61 : vector<1x1xf32> to vector<8x1xf32>
    %63 = arith.addf %60, %62 : vector<8x1xf32>
    %c0_47 = arith.constant 0 : index
    %c0_48 = arith.constant 0 : index
    %64 = vector.load %arg6[%c0_47, %c0_48] : memref<8x1xf32, #tpu.memory_space<vmem>>, vector<8x1xf32>
    tpu.vector_store %arg6[%c0_47, %c0_48], %63 {strides = array<i32>} : memref<8x1xf32, #tpu.memory_space<vmem>>, vector<8x1xf32>,
    return
  }
  func.func @transform_0(%arg0: i32) -> (i32, i32) {
    %c0_i32 = arith.constant 0 : i32
    %c0_i32_0 = arith.constant 0 : i32
    return %arg0, %c0_i32 : i32, i32
  }
  func.func @transform_1(%arg0: i32) -> (i32, i32) {
    %c0_i32 = arith.constant 0 : i32
    %c0_i32_0 = arith.constant 0 : i32
    %c0_i32_1 = arith.constant 0 : i32
    return %c0_i32, %c0_i32_0 : i32, i32
  }
  func.func @transform_2(%arg0: i32) -> (i32, i32, i32) {
    %c0_i32 = arith.constant 0 : i32
    %c0_i32_0 = arith.constant 0 : i32
    %c0_i32_1 = arith.constant 0 : i32
    %c0_i32_2 = arith.constant 0 : i32
    return %c0_i32, %c0_i32_0, %c0_i32_1 : i32, i32, i32
  }
  func.func @transform_3(%arg0: i32) -> (i32, i32) {
    %c0_i32 = arith.constant 0 : i32
    %c0_i32_0 = arith.constant 0 : i32
    %c0_i32_1 = arith.constant 0 : i32
    return %c0_i32, %c0_i32_0 : i32, i32
  }
  func.func @transform_4(%arg0: i32) -> (i32, i32, i32) {
    %c0_i32 = arith.constant 0 : i32
    %c0_i32_0 = arith.constant 0 : i32
    %c0_i32_1 = arith.constant 0 : i32
    %c0_i32_2 = arith.constant 0 : i32
    return %c0_i32, %c0_i32_0, %c0_i32_1 : i32, i32, i32
  }
  func.func @transform_5(%arg0: i32) -> (i32, i32) {
    %c0_i32 = arith.constant 0 : i32
    %c0_i32_0 = arith.constant 0 : i32
    return %arg0, %c0_i32 : i32, i32
  }
}

module attributes {stable_mosaic.version = 11 : i64} {
  func.func @mlp_kernel(%arg0: i32, %arg1: memref<8x32xf32, #tpu.memory_space<vmem>>, %arg2: memref<32x128xf32, #tpu.memory_space<vmem>>, %arg3: memref<5x128x128xf32, #tpu.memory_space<vmem>>, %arg4: memref<1x128xf32, #tpu.memory_space<vmem>>, %arg5: memref<7x1x128xf32, #tpu.memory_space<vmem>>, %arg6: memref<8x1xf32, #tpu.memory_space<vmem>>) attributes {dimension_semantics = [#tpu.dimension_semantics<parallel>], iteration_bounds = array<i64: 4>, scalar_prefetch = 0 : i64, scratch_operands = 0 : i64, tpu.core_type = #tpu.core_type<tc>, window_params = [{transform_indices = @transform_0, window_bounds = array<i64: 8, 32>}, {pipeline_mode = #tpu.pipeline_mode<synchronous>, transform_indices = @transform_1, window_bounds = array<i64: 32, 128>}, {pipeline_mode = #tpu.pipeline_mode<synchronous>, transform_indices = @transform_2, window_bounds = array<i64: 5, 128, 128>}, {pipeline_mode = #tpu.pipeline_mode<synchronous>, transform_indices = @transform_3, window_bounds = array<i64: 1, 128>}, {pipeline_mode = #tpu.pipeline_mode<synchronous>, transform_indices = @transform_4, window_bounds = array<i64: 7, 1, 128>}, {transform_indices = @transform_5, window_bounds = array<i64: 8, 1>}]} {
    %c0 = arith.constant 0 : index
    %c0_0 = arith.constant 0 : index
    %0 = vector.load %arg2[%c0, %c0_0] : memref<32x128xf32, #tpu.memory_space<vmem>>, vector<32x128xf32>
    %c0_1 = arith.constant 0 : index
    %c0_2 = arith.constant 0 : index
    %1 = vector.load %arg1[%c0_1, %c0_2] : memref<8x32xf32, #tpu.memory_space<vmem>>, vector<8x32xf32>
    %cst = arith.constant dense<0.000000e+00> : vector<8x128xf32>
    %2 = tpu.matmul %1, %0, %cst {dimension_numbers = #tpu.dot_dimension_numbers<[1], [0], [0], [1], [0, 0, 1, 1], [], []>} : vector<8x32xf32>, vector<32x128xf32>, vector<8x128xf32> -> vector<8x128xf32>
    %c0_3 = arith.constant 0 : index
    %c0_4 = arith.constant 0 : index
    %c0_5 = arith.constant 0 : index
    %3 = vector.load %arg5[%c0_3, %c0_4, %c0_5] : memref<7x1x128xf32, #tpu.memory_space<vmem>>, vector<1x1x128xf32>
    %4 = vector.shape_cast %3 : vector<1x1x128xf32> to vector<1x128xf32>
    %5 = vector.broadcast %4 : vector<1x128xf32> to vector<8x128xf32>
    %6 = arith.addf %2, %5 : vector<8x128xf32>
    %cst_6 = arith.constant 0.000000e+00 : f32
    %7 = vector.broadcast %cst_6 : f32 to vector<8x128xf32>
    %8 = arith.maximumf %6, %7 : vector<8x128xf32>
    %c0_7 = arith.constant 0 : index
    %c0_8 = arith.constant 0 : index
    %c0_9 = arith.constant 0 : index
    %9 = vector.load %arg3[%c0_7, %c0_8, %c0_9] : memref<5x128x128xf32, #tpu.memory_space<vmem>>, vector<1x128x128xf32>
    %10 = vector.shape_cast %9 : vector<1x128x128xf32> to vector<128x128xf32>
    %cst_10 = arith.constant dense<0.000000e+00> : vector<8x128xf32>
    %11 = tpu.matmul %8, %10, %cst_10 {dimension_numbers = #tpu.dot_dimension_numbers<[1], [0], [0], [1], [0, 0, 1, 1], [], []>} : vector<8x128xf32>, vector<128x128xf32>, vector<8x128xf32> -> vector<8x128xf32>
    %c1 = arith.constant 1 : index
    %c0_11 = arith.constant 0 : index
    %c0_12 = arith.constant 0 : index
    %12 = vector.load %arg5[%c1, %c0_11, %c0_12] : memref<7x1x128xf32, #tpu.memory_space<vmem>>, vector<1x1x128xf32>
    %13 = vector.shape_cast %12 : vector<1x1x128xf32> to vector<1x128xf32>
    %14 = vector.broadcast %13 : vector<1x128xf32> to vector<8x128xf32>
    %15 = arith.addf %11, %14 : vector<8x128xf32>
    %cst_13 = arith.constant 0.000000e+00 : f32
    %16 = vector.broadcast %cst_13 : f32 to vector<8x128xf32>
    %17 = arith.maximumf %15, %16 : vector<8x128xf32>
    %c1_14 = arith.constant 1 : index
    %c0_15 = arith.constant 0 : index
    %c0_16 = arith.constant 0 : index
    %18 = vector.load %arg3[%c1_14, %c0_15, %c0_16] : memref<5x128x128xf32, #tpu.memory_space<vmem>>, vector<1x128x128xf32>
    %19 = vector.shape_cast %18 : vector<1x128x128xf32> to vector<128x128xf32>
    %cst_17 = arith.constant dense<0.000000e+00> : vector<8x128xf32>
    %20 = tpu.matmul %17, %19, %cst_17 {dimension_numbers = #tpu.dot_dimension_numbers<[1], [0], [0], [1], [0, 0, 1, 1], [], []>} : vector<8x128xf32>, vector<128x128xf32>, vector<8x128xf32> -> vector<8x128xf32>
    %c2 = arith.constant 2 : index
    %c0_18 = arith.constant 0 : index
    %c0_19 = arith.constant 0 : index
    %21 = vector.load %arg5[%c2, %c0_18, %c0_19] : memref<7x1x128xf32, #tpu.memory_space<vmem>>, vector<1x1x128xf32>
    %22 = vector.shape_cast %21 : vector<1x1x128xf32> to vector<1x128xf32>
    %23 = vector.broadcast %22 : vector<1x128xf32> to vector<8x128xf32>
    %24 = arith.addf %20, %23 : vector<8x128xf32>
    %cst_20 = arith.constant 0.000000e+00 : f32
    %25 = vector.broadcast %cst_20 : f32 to vector<8x128xf32>
    %26 = arith.maximumf %24, %25 : vector<8x128xf32>
    %c2_21 = arith.constant 2 : index
    %c0_22 = arith.constant 0 : index
    %c0_23 = arith.constant 0 : index
    %27 = vector.load %arg3[%c2_21, %c0_22, %c0_23] : memref<5x128x128xf32, #tpu.memory_space<vmem>>, vector<1x128x128xf32>
    %28 = vector.shape_cast %27 : vector<1x128x128xf32> to vector<128x128xf32>
    %cst_24 = arith.constant dense<0.000000e+00> : vector<8x128xf32>
    %29 = tpu.matmul %26, %28, %cst_24 {dimension_numbers = #tpu.dot_dimension_numbers<[1], [0], [0], [1], [0, 0, 1, 1], [], []>} : vector<8x128xf32>, vector<128x128xf32>, vector<8x128xf32> -> vector<8x128xf32>
    %c3 = arith.constant 3 : index
    %c0_25 = arith.constant 0 : index
    %c0_26 = arith.constant 0 : index
    %30 = vector.load %arg5[%c3, %c0_25, %c0_26] : memref<7x1x128xf32, #tpu.memory_space<vmem>>, vector<1x1x128xf32>
    %31 = vector.shape_cast %30 : vector<1x1x128xf32> to vector<1x128xf32>
    %32 = vector.broadcast %31 : vector<1x128xf32> to vector<8x128xf32>
    %33 = arith.addf %29, %32 : vector<8x128xf32>
    %cst_27 = arith.constant 0.000000e+00 : f32
    %34 = vector.broadcast %cst_27 : f32 to vector<8x128xf32>
    %35 = arith.maximumf %33, %34 : vector<8x128xf32>
    %c3_28 = arith.constant 3 : index
    %c0_29 = arith.constant 0 : index
    %c0_30 = arith.constant 0 : index
    %36 = vector.load %arg3[%c3_28, %c0_29, %c0_30] : memref<5x128x128xf32, #tpu.memory_space<vmem>>, vector<1x128x128xf32>
    %37 = vector.shape_cast %36 : vector<1x128x128xf32> to vector<128x128xf32>
    %cst_31 = arith.constant dense<0.000000e+00> : vector<8x128xf32>
    %38 = tpu.matmul %35, %37, %cst_31 {dimension_numbers = #tpu.dot_dimension_numbers<[1], [0], [0], [1], [0, 0, 1, 1], [], []>} : vector<8x128xf32>, vector<128x128xf32>, vector<8x128xf32> -> vector<8x128xf32>
    %c4 = arith.constant 4 : index
    %c0_32 = arith.constant 0 : index
    %c0_33 = arith.constant 0 : index
    %39 = vector.load %arg5[%c4, %c0_32, %c0_33] : memref<7x1x128xf32, #tpu.memory_space<vmem>>, vector<1x1x128xf32>
    %40 = vector.shape_cast %39 : vector<1x1x128xf32> to vector<1x128xf32>
    %41 = vector.broadcast %40 : vector<1x128xf32> to vector<8x128xf32>
    %42 = arith.addf %38, %41 : vector<8x128xf32>
    %cst_34 = arith.constant 0.000000e+00 : f32
    %43 = vector.broadcast %cst_34 : f32 to vector<8x128xf32>
    %44 = arith.maximumf %42, %43 : vector<8x128xf32>
    %c4_35 = arith.constant 4 : index
    %c0_36 = arith.constant 0 : index
    %c0_37 = arith.constant 0 : index
    %45 = vector.load %arg3[%c4_35, %c0_36, %c0_37] : memref<5x128x128xf32, #tpu.memory_space<vmem>>, vector<1x128x128xf32>
    %46 = vector.shape_cast %45 : vector<1x128x128xf32> to vector<128x128xf32>
    %cst_38 = arith.constant dense<0.000000e+00> : vector<8x128xf32>
    %47 = tpu.matmul %44, %46, %cst_38 {dimension_numbers = #tpu.dot_dimension_numbers<[1], [0], [0], [1], [0, 0, 1, 1], [], []>} : vector<8x128xf32>, vector<128x128xf32>, vector<8x128xf32> -> vector<8x128xf32>
    %c5 = arith.constant 5 : index
    %c0_39 = arith.constant 0 : index
    %c0_40 = arith.constant 0 : index
    %48 = vector.load %arg5[%c5, %c0_39, %c0_40] : memref<7x1x128xf32, #tpu.memory_space<vmem>>, vector<1x1x128xf32>
    %49 = vector.shape_cast %48 : vector<1x1x128xf32> to vector<1x128xf32>
    %50 = vector.broadcast %49 : vector<1x128xf32> to vector<8x128xf32>
    %51 = arith.addf %47, %50 : vector<8x128xf32>
    %cst_41 = arith.constant 0.000000e+00 : f32
    %52 = vector.broadcast %cst_41 : f32 to vector<8x128xf32>
    %53 = arith.maximumf %51, %52 : vector<8x128xf32>
    %c0_42 = arith.constant 0 : index
    %c0_43 = arith.constant 0 : index
    %54 = vector.load %arg4[%c0_42, %c0_43] : memref<1x128xf32, #tpu.memory_space<vmem>>, vector<1x128xf32>
    %c6 = arith.constant 6 : index
    %c0_44 = arith.constant 0 : index
    %c0_45 = arith.constant 0 : index
    %55 = vector.load %arg5[%c6, %c0_44, %c0_45] : memref<7x1x128xf32, #tpu.memory_space<vmem>>, vector<1x1x128xf32>
    %56 = vector.shape_cast %55 : vector<1x1x128xf32> to vector<1x128xf32>
    %57 = vector.broadcast %54 : vector<1x128xf32> to vector<8x128xf32>
    %58 = arith.mulf %53, %57 : vector<8x128xf32>
    %cst_46 = arith.constant dense<0.000000e+00> : vector<8xf32>
    %59 = vector.multi_reduction <add>, %58, %cst_46 [1] : vector<8x128xf32> to vector<8xf32>
    %60 = vector.shape_cast %59 : vector<8xf32> to vector<8x1xf32>
    %61 = vector.extract_strided_slice %56 {offsets = [0, 0], sizes = [1, 1], strides = [1, 1]} : vector<1x128xf32> to vector<1x1xf32>
    %62 = vector.broadcast %61 : vector<1x1xf32> to vector<8x1xf32>
    %63 = arith.addf %60, %62 : vector<8x1xf32>
    %c0_47 = arith.constant 0 : index
    %c0_48 = arith.constant 0 : index
    %64 = vector.load %arg6[%c0_47, %c0_48] : memref<8x1xf32, #tpu.memory_space<vmem>>, vector<8x1xf32>
    tpu.vector_store %arg6[%c0_47, %c0_48], %63 {strides = array<i32>} : memref<8x1xf32, #tpu.memory_space<vmem>>, vector<8x1xf32>,
    return
  }
  func.func @transform_0(%arg0: i32) -> (i32, i32) {
    %c0_i32 = arith.constant 0 : i32
    %c0_i32_0 = arith.constant 0 : i32
    return %arg0, %c0_i32 : i32, i32
  }
  func.func @transform_1(%arg0: i32) -> (i32, i32) {
    %c0_i32 = arith.constant 0 : i32
    %c0_i32_0 = arith.constant 0 : i32
    %c0_i32_1 = arith.constant 0 : i32
    return %c0_i32, %c0_i32_0 : i32, i32
  }
  func.func @transform_2(%arg0: i32) -> (i32, i32, i32) {
    %c0_i32 = arith.constant 0 : i32
    %c0_i32_0 = arith.constant 0 : i32
    %c0_i32_1 = arith.constant 0 : i32
    %c0_i32_2 = arith.constant 0 : i32
    return %c0_i32, %c0_i32_0, %c0_i32_1 : i32, i32, i32
  }
  func.func @transform_3(%arg0: i32) -> (i32, i32) {
    %c0_i32 = arith.constant 0 : i32
    %c0_i32_0 = arith.constant 0 : i32
    %c0_i32_1 = arith.constant 0 : i32
    return %c0_i32, %c0_i32_0 : i32, i32
  }
  func.func @transform_4(%arg0: i32) -> (i32, i32, i32) {
    %c0_i32 = arith.constant 0 : i32
    %c0_i32_0 = arith.constant 0 : i32
    %c0_i32_1 = arith.constant 0 : i32
    %c0_i32_2 = arith.constant 0 : i32
    return %c0_i32, %c0_i32_0, %c0_i32_1 : i32, i32, i32
  }
  func.func @transform_5(%arg0: i32) -> (i32, i32) {
    %c0_i32 = arith.constant 0 : i32
    %c0_i32_0 = arith.constant 0 : i32
    return %arg0, %c0_i32 : i32, i32
  }
}

</mosaic_0001>

<bundles_post_ra>
// kernel: tpu_custom_call.1
= control target key start
LH: loop header
LB: loop body
LE: loop exit
PB: predicated region body
PF: predicated region fallthrough
CT: control target
= control target key end

     0   :  { %10 = vsyncpa [#allocation3], 0  ;;  %s1792_s0 = inlined_call_operand.hbm [shape: f32[32,32], index: 0, kind: input, shape index: {}]   ;;  %s1793_s1 = inlined_call_operand.hbm [shape: f32[32,128], index: 1, kind: input, shape index: {}]   ;;  %s1794_s2 = inlined_call_operand.hbm [shape: f32[5,128,128], index: 2, kind: input, shape index: {}]   ;;  %s1795_s3 = inlined_call_operand.hbm [shape: f32[1,128], index: 3, kind: input, shape index: {}]   ;;  %s1796_s4 = inlined_call_operand.vmem [shape: f32[7,1,128], index: 4, kind: input, shape index: {}]   ;;  %s1797_s5 = inlined_call_operand.vmem [shape: f32[32,1], index: 5, kind: output, shape index: {}]  }
   0x1   :  { %12 = vsyncpa [#allocation3 + $0x1], 0 }
   0x2   :  { %13 = vsyncpa [#allocation5], 0 }
   0x3   :  { %14 = vsyncpa [#allocation8], 0  ;;  %s1532_s18 = smov 0   ;;  %s1534_s19 = smov 0  }
   0x4   :  { %s1536_s20 = smov 0   ;;  %s1538_s21 = smov 0  }
   0x5 LB: > { %s1551_s22 = sadd.s32 4294967295, %s1492_s21   ;;  %p40_p0 = scmp.ne.s32.totalorder %s1484_s19, %s1480_s18  ;;  %s1492_s21 = sphi %s1538_s21, %s1814_s21   ;;  %s1488_s20 = sphi %s1536_s20, %s1813_s20   ;;  %s1484_s19 = sphi %s1534_s19, %s1812_s19   ;;  %s1480_s18 = sphi %s1532_s18, %s1811_s18  }
   0x6   : > { %p1798_p1 = scmp.eq.s32.totalorder %s1551_s22, 0  ;;  %p964_p2 = scmp.ge.s32.totalorder %s1492_s21, 1 }
   0x7   : > { %p161_p3 = scmp.lt.s32.totalorder %s1492_s21, 5  ;;  %s1494_s25 = smov [#allocation4]  }
   0x8   : > { %p1559_p4 = por %p1798_p1, %p40_p0  ;;  %s173_s26 = sshll.u32 %s1494_s25, 4  ;;  %s174_s26 = int_to_ptr.vmem [resolvable:$true] %s173_s26 }
   0x9   : > { %p1563_p5 = pnand %p964_p2, %p161_p3  ;;  %s1495_s28 = smov [#allocation6]  }
   0xa   : > { %s1801_s23 = scalar_select %p1559_p4, 1, 0 }
   0xb   : > { %s1802_s24 = scalar_select %p1563_p5, 1, 0 }
   0xc   : > { %p1284_p6 = pneg %p1563_p5  ;;  %s186_s29 = sshll.u32 %s1495_s28, 4  ;;  %s187_s29 = int_to_ptr.vmem [resolvable:$true] %s186_s29 }
   0xd   : > { %s1496_s30 = smov [#allocation7]   ;;  %s1355_s7 = scalar_lea.vmem %s174_s26, 512 }
   0xe   : > { %p1571_p7 = pnand %p1284_p6, %p1798_p1  ;;  %s200_s6 = sshll.u32 %s1496_s30, 4  ;;  %s201_s6 = int_to_ptr.vmem [resolvable:$true] %s200_s6 }
   0xf   : > { %p1356_p9 = scmp.ne.s32.totalorder %s174_s26, %s1355_s7  ;;  %p1363_p12 = scmp.lt.s32.totalorder %s174_s26, %s174_s26 }
  0x10   : > { %p1346_p8 = pneg %p1571_p7  ;;  %p1364_p13 = scmp.lt.s32.totalorder %s1355_s7, %s1355_s7 }
  0x12   : > { %p1358_p10 = pnand %p1356_p9, %p1346_p8  ;;  %p1365_p0 = por %p1364_p13, %p1363_p12 }
  0x14   : > { %p1359_p11 = pneg %p1358_p10 }
  0x16   : > { %p1366_p2 = pnand %p1365_p0, %p1359_p11 }
  0x18   : > { %1369 = shalt.err (!%p1366_p2)
}
  0x19   : > { %s1497_s8 = smov 128   ;;  %s1498_s9 = smov 8  }
  0x1a   : > { %1287 = dma.hbm_to_vmem [thread:$0]  (!%p1571_p7), %s1793_s1, 512, %s174_s26, [#allocation5], %s1497_s8, %s1497_s8, %s1498_s9  }
  0x1b   : > { %s1381_s12 = scalar_lea.vmem %s187_s29, 10240  ;;  %p1389_p10 = scmp.lt.s32.totalorder %s187_s29, %s187_s29 }
  0x1c   : > { %p1382_p3 = scmp.ne.s32.totalorder %s187_s29, %s1381_s12  ;;  %p1390_p1 = scmp.lt.s32.totalorder %s1381_s12, %s1381_s12 }
  0x1e   : > { %p1384_p6 = pnand %p1382_p3, %p1346_p8  ;;  %p1391_p12 = por %p1390_p1, %p1389_p10 }
  0x20   : > { %p1385_p9 = pneg %p1384_p6 }
  0x22   : > { %p1392_p11 = pnand %p1391_p12, %p1385_p9 }
  0x24   : > { %1395 = shalt.err (!%p1392_p11)
}
  0x25   : > { %1290 = dma.hbm_to_vmem [thread:$0]  (!%p1571_p7), %s1794_s2, 10240, %s187_s29, [#allocation5], %s1497_s8, %s1497_s8, %s1498_s9  }
  0x26   : > { %s1407_s15 = scalar_lea.vmem %s201_s6, 16  ;;  %s1414_s16 = scalar_lea.vmem %s201_s6, 32 }
  0x27   : > { %p1408_p13 = scmp.ne.s32.totalorder %s201_s6, %s1407_s15  ;;  %p1415_p3 = scmp.lt.s32.totalorder %s201_s6, %s201_s6 }
  0x28   : > { %p1416_p6 = scmp.lt.s32.totalorder %s1414_s16, %s1407_s15 }
  0x29   : > { %p1410_p0 = pnand %p1408_p13, %p1346_p8 }
  0x2a   : > { %p1417_p1 = por %p1416_p6, %p1415_p3 }
  0x2b   : > { %p1411_p2 = pneg %p1410_p0 }
  0x2d   : > { %p1418_p9 = pnand %p1417_p1, %p1411_p2 }
  0x2f   : > { %1421 = shalt.err (!%p1418_p9)
}
  0x30   : > { %1293 = dma.hbm_to_vmem [thread:$0]  (!%p1571_p7), %s1795_s3, 16, %s201_s6, [#allocation8]  }
  0x31   : > { %s1602_s25 = sadd.s32 1, %s1492_s21   ;;  %s27_s28 = sadd.s32 1, %s1488_s20 }
  0x32   : > { %s24_s26 = ssub.s32 %s1492_s21, %s1602_s25  ;;  %p34_p10 = scmp.ne.s32.totalorder %s1488_s20, %s1484_s19 }
  0x33   : > { %p25_p8 = scmp.eq.s32.totalorder %s24_s26, 0  ;;  %p35_p12 = scmp.eq.s32.totalorder %s1492_s21, 0 }
  0x34   : > { %p1301_p11 = scmp.lt.s32.totalorder %s1492_s21, 4  ;;  %s214_s29 = sand.u32 1, %s1488_s20  }
  0x35   : > { %s1612_s27 = scalar_select %p25_p8, %s1488_s20, %s27_s28  }
  0x36   : > { %p36_p13 = por %p35_p12, %p34_p10  ;;  %s969_s30 = sshll.u32 %s214_s29, 3 }
  0x37   : > { %s970_s7 = sshll.u32 %s1492_s21, 7  ;;  %s218_s6 = scalar_lea.vmem [#allocation2], %s969_s30 }
  0x38   : > { %s1619_s10 = scalar_lea.hbm %s1792_s0, %s970_s7  ;;  %s225_s11 = sshll.u32 %s218_s6, 4  ;;  %s226_s11 = int_to_ptr.vmem [resolvable:$true] %s225_s11 }
  0x39   : > { %p1621_p7 = pnand %p1301_p11, %p36_p13  ;;  %s215_s13 = scalar_lea.sflag [#allocation3], %s214_s29 }
  0x3a   : > { %s1422_s14 = scalar_lea.hbm %s1619_s10, 128  ;;  %s1427_s16 = scalar_lea.hbm %s1792_s0, 512 }
  0x3b   : > { %p1423_p0 = scmp.ne.s32.totalorder %s1619_s10, %s1422_s14  ;;  %p1424_p2 = pneg %p1621_p7 }
  0x3c   : > { %p1428_p1 = scmp.lt.s32.totalorder %s1619_s10, %s1792_s0  ;;  %p1429_p9 = scmp.lt.s32.totalorder %s1427_s16, %s1422_s14 }
  0x3d   : > { %p1425_p3 = pnand %p1424_p2, %p1423_p0 }
  0x3e   : > { %p1430_p8 = por %p1429_p9, %p1428_p1 }
  0x3f   : > { %p1426_p6 = pneg %p1425_p3 }
  0x41   : > { %p1431_p10 = pnand %p1430_p8, %p1426_p6 }
  0x43   : > { %1434 = shalt.err (!%p1431_p10)
}
  0x44   : > { %s1435_s26 = scalar_lea.vmem %s226_s11, 128  ;;  %s1499_s28 = smov [#allocation2]  }
  0x45   : > { %p1436_p12 = scmp.ne.s32.totalorder %s226_s11, %s1435_s26  ;;  %s1440_s29 = sshll.u32 %s1499_s28, 4  ;;  %s1441_s29 = int_to_ptr.vmem [resolvable:$false] %s1440_s29 }
  0x46   : > { %s1442_s30 = scalar_lea.vmem %s1441_s29, 256  ;;  %p1443_p0 = scmp.lt.s32.totalorder %s226_s11, %s1441_s29 }
  0x47   : > { %p1438_p11 = pnand %p1436_p12, %p1424_p2  ;;  %p1444_p3 = scmp.lt.s32.totalorder %s1442_s30, %s1435_s26 }
  0x49   : > { %p1439_p13 = pneg %p1438_p11  ;;  %p1445_p4 = por %p1444_p3, %p1443_p0 }
  0x4b   : > { %p1446_p5 = pnand %p1445_p4, %p1439_p13 }
  0x4d   : > { %1449 = shalt.err (!%p1446_p5)
}
  0x4e   : > { %1297 = dma.hbm_to_vmem [thread:$0]  (!%p1621_p7), %s1619_s10, 128, %s226_s11, %s215_s13  }
  0x4f   : > { %p1805_p6 = scmp.ne.s32.totalorder %s1802_s24, 0 }
  0x50   : > { %s236_s7 = sand.u32 (!%p1805_p6), 1, %s1484_s19   ;;  %p1806_p2 = scmp.ne.s32.totalorder (!%p1805_p6), %s1801_s23, 0 }
  0x51   : > { %234 = sbr.rel (%p1805_p6) target bundleno = 1428 (0x594), region = 40  ;;  %s1642_s8 = sshll.u32 (!%p1805_p6), %s236_s7, 3 }
  0x52   : > { %s237_s9 = scalar_lea.sflag (!%p1805_p6), [#allocation3], %s236_s7  ;;  %s240_s6 = scalar_lea.vmem (!%p1805_p6), [#allocation2], %s1642_s8 }
  0x56   : > { %1467 = dma.done.wait (%p1806_p2), %s237_s9, 128  }
  0x57   : > { %1469 = vsyncadd (%p1806_p2), %s237_s9, 4294967168  ;;  %p1807_p4 = scmp.eq.s32.totalorder %s1551_s22, 0 }
  0x59   : > { %1471 = dma.done.wait (%p1807_p4), [#allocation5], 10752   ;;  %p1808_p5 = pmov %p1807_p4 }
  0x5a   : > { %p1809_p7 = pmov %p1807_p4 }
  0x5b   : > { %1473 = vsyncadd (%p1808_p5), [#allocation5], 4294956544 }
  0x5c   : > { %1475 = dma.done.wait (%p1809_p7), [#allocation8], 16   ;;  %p1810_p1 = pmov %p1807_p4 }
  0x5d   : > { %v1500_v0 = vmov 0.0   ;;  %vm1501_vm0 = vmmov 0   ;;  %v285_v1 = vld [vmem:[#allocation4 + $0x18] sm:$0xff]  ;;  %v284_v2 = vld [vmem:[#allocation4 + $0x10] sm:$0xff]  ;;  %v283_v4 = vld [vmem:[#allocation4 + $0x8] sm:$0xff]  ;;  %vm294_vm1 = vcmask 261120  }
  0x5e   : > { %1477 = vsyncadd (%p1810_p1), [#allocation8], 4294967280  ;;  %1084 = vmatprep.subr.mxu0 %v1500_v0  ;;  %1092 = vmatprep.mubr.msk.f32.mxu0 %vm1501_vm0, %v1500_v0  ;;  %v384_v3 = vld [vmem:[#allocation6 + $0x78] sm:$0xff]  ;;  %v383_v5 = vld [vmem:[#allocation6 + $0x70] sm:$0xff]  ;;  %p278_p9 = scmp.lt.s32.totalorder %s1551_s22, 3  ;;  %vm867_vm2 = vcmask 7168  }
  0x5f   : > { %1095 = vmatprep.subr.mxu1 %v1500_v0  ;;  %1127 = vmatprep.mubr.msk.f32.mxu1 %vm1501_vm0, %v1500_v0  ;;  %v382_v6 = vld [vmem:[#allocation6 + $0x68] sm:$0xff]  ;;  %v282_v7 = vld [vmem:[#allocation4] sm:$0xff]  ;;  %v286_v8 = vld [vmem:[%s240_s6] sm:$0xff] }
  0x60   : > { %1085 = vmatpush3.msra.mxu0 %v285_v1  ;;  %1096 = vmatpush3.msra.mxu1 %v384_v3  ;;  %v381_v9 = vld [vmem:[#allocation6 + $0x60] sm:$0xff]  ;;  %v380_v10 = vld [vmem:[#allocation6 + $0x58] sm:$0xff]  ;;  %v379_v11 = vld [vmem:[#allocation6 + $0x50] sm:$0xff]  ;;  %s1816_s22 = smov (!%p278_p9, %s1551_s22), 3 }
  0x61   : > { %1086 = vmatprep.subr.mxu0 %v1500_v0  ;;  %1097 = vmatprep.subr.mxu1 %v1500_v0  ;;  %v378_v12 = vld [vmem:[#allocation6 + $0x48] sm:$0xff]  ;;  %v377_v13 = vld [vmem:[#allocation6 + $0x40] sm:$0xff]  ;;  %v376_v14 = vld [vmem:[#allocation6 + $0x38] sm:$0xff]  ;;  %s976_s26 = sshll.u32 %s1816_s22, 3 }
  0x62   : > { %1087 = vmatpush3.msra.mxu0 %v284_v2  ;;  %1098 = vmatpush3.msra.mxu1 %v383_v5  ;;  %v375_v15 = vld [vmem:[#allocation6 + $0x30] sm:$0xff]  ;;  %v374_v16 = vld [vmem:[#allocation6 + $0x28] sm:$0xff]  ;;  %v373_v17 = vld [vmem:[#allocation6 + $0x20] sm:$0xff]  ;;  %s281_s8 = scalar_lea.vmem %s1797_s5, %s976_s26 }
  0x63   : > { %1088 = vmatprep.subr.mxu0 %v1500_v0  ;;  %1099 = vmatprep.subr.mxu1 %v1500_v0  ;;  %v372_v18 = vld [vmem:[#allocation6 + $0x18] sm:$0xff]  ;;  %v371_v19 = vld [vmem:[#allocation6 + $0x10] sm:$0xff]  ;;  %v370_v20 = vld [vmem:[#allocation6 + $0x8] sm:$0xff] }
  0x64   : > { %1089 = vmatpush3.msra.mxu0 %v283_v4  ;;  %1100 = vmatpush3.msra.mxu1 %v382_v6  ;;  %v369_v21 = vld [vmem:[#allocation6] sm:$0xff]  ;;  %v480_v22 = vld [vmem:[#allocation6 + $0xf8] sm:$0xff]  ;;  %v479_v23 = vld [vmem:[#allocation6 + $0xf0] sm:$0xff] }
  0x65   : > { %1090 = vmatprep.subr.mxu0 %v1500_v0  ;;  %1101 = vmatprep.subr.mxu1 %v1500_v0  ;;  %v478_v24 = vld [vmem:[#allocation6 + $0xe8] sm:$0xff]  ;;  %v477_v25 = vld [vmem:[#allocation6 + $0xe0] sm:$0xff]  ;;  %v476_v26 = vld [vmem:[#allocation6 + $0xd8] sm:$0xff] }
  0x66   : > { %1091 = vmatpush3.msra.mxu0 %v282_v7  ;;  %1102 = vmatpush3.msra.mxu1 %v381_v9  ;;  %v475_v27 = vld [vmem:[#allocation6 + $0xd0] sm:$0xff]  ;;  %v474_v28 = vld [vmem:[#allocation6 + $0xc8] sm:$0xff]  ;;  %v473_v29 = vld [vmem:[#allocation6 + $0xc0] sm:$0xff] }
  0x67   : > { %1093 = vmatmul.mubr.msk.f32.vlgmr.msra.gmra.mxu0 %vm294_vm1, %v286_v8  ;;  %1103 = vmatprep.subr.mxu1 %v1500_v0  ;;  %v472_v30 = vld [vmem:[#allocation6 + $0xb8] sm:$0xff]  ;;  %v471_v31 = vld [vmem:[#allocation6 + $0xb0] sm:$0xff]  ;;  %v470_v32 = vld [vmem:[#allocation6 + $0xa8] sm:$0xff] }
  0x68   : > { %1130 = vmatprep.subr.mxu0 %v1500_v0  ;;  %1104 = vmatpush3.msra.mxu1 %v380_v10  ;;  %v469_v33 = vld [vmem:[#allocation6 + $0xa0] sm:$0xff]  ;;  %v468_v34 = vld [vmem:[#allocation6 + $0x98] sm:$0xff]  ;;  %v977_v35 = vld [vmem:[%s1796_s4] ss:$0 sm:$0xff] }
  0x69   : > { %1162 = vmatprep.mubr.msk.f32.mxu0 %vm1501_vm0, %v1500_v0  ;;  %1105 = vmatprep.subr.mxu1 %v1500_v0  ;;  %v467_v40 = vld [vmem:[#allocation6 + $0x90] sm:$0xff]  ;;  %v466_v41 = vld [vmem:[#allocation6 + $0x88] sm:$0xff]  ;;  %v465_v42 = vld [vmem:[#allocation6 + $0x80] sm:$0xff] }
  0x6a   : > { %1106 = vmatpush3.msra.mxu1 %v379_v11  ;;  %1131 = vmatpush3.msra.mxu0 %v480_v22  ;;  %v576_v43 = vld [vmem:[#allocation6 + $0x178] sm:$0xff]  ;;  %v575_v44 = vld [vmem:[#allocation6 + $0x170] sm:$0xff]  ;;  %v574_v45 = vld [vmem:[#allocation6 + $0x168] sm:$0xff] }
  0x6b   : > { %1107 = vmatprep.subr.mxu1 %v1500_v0  ;;  %1132 = vmatprep.subr.mxu0 %v1500_v0  ;;  %v573_v46 = vld [vmem:[#allocation6 + $0x160] sm:$0xff]  ;;  %v572_v47 = vld [vmem:[#allocation6 + $0x158] sm:$0xff]  ;;  %v571_v48 = vld [vmem:[#allocation6 + $0x150] sm:$0xff] }
  0x6c   : > { %1108 = vmatpush3.msra.mxu1 %v378_v12  ;;  %1133 = vmatpush3.msra.mxu0 %v479_v23  ;;  %v570_v49 = vld [vmem:[#allocation6 + $0x148] sm:$0xff]  ;;  %v569_v50 = vld [vmem:[#allocation6 + $0x140] sm:$0xff]  ;;  %v568_v51 = vld [vmem:[#allocation6 + $0x138] sm:$0xff] }
  0x6d   : > { %1109 = vmatprep.subr.mxu1 %v1500_v0  ;;  %1134 = vmatprep.subr.mxu0 %v1500_v0  ;;  %v567_v52 = vld [vmem:[#allocation6 + $0x130] sm:$0xff]  ;;  %v566_v53 = vld [vmem:[#allocation6 + $0x128] sm:$0xff]  ;;  %v565_v54 = vld [vmem:[#allocation6 + $0x120] sm:$0xff] }
  0x6e   : > { %1110 = vmatpush3.msra.mxu1 %v377_v13  ;;  %1135 = vmatpush3.msra.mxu0 %v478_v24  ;;  %v564_v55 = vld [vmem:[#allocation6 + $0x118] sm:$0xff]  ;;  %v980_v56 = vld [vmem:[%s1796_s4 + $0x1] ss:$0 sm:$0xff]  ;;  %v562_v62 = vld [vmem:[#allocation6 + $0x108] sm:$0xff] }
  0x6f   : > { %1111 = vmatprep.subr.mxu1 %v1500_v0  ;;  %1136 = vmatprep.subr.mxu0 %v1500_v0  ;;  %v563_v61 = vld [vmem:[#allocation6 + $0x110] sm:$0xff]  ;;  %v561_v63 = vld [vmem:[#allocation6 + $0x100] sm:$0xff]  ;;  %v672_v1 = vld [vmem:[#allocation6 + $0x1f8] sm:$0xff] }
  0x70   : > { %1112 = vmatpush3.msra.mxu1 %v376_v14  ;;  %1137 = vmatpush3.msra.mxu0 %v477_v25  ;;  %v671_v2 = vld [vmem:[#allocation6 + $0x1f0] sm:$0xff]  ;;  %v670_v3 = vld [vmem:[#allocation6 + $0x1e8] sm:$0xff]  ;;  %v669_v4 = vld [vmem:[#allocation6 + $0x1e0] sm:$0xff] }
  0x71   : > { %1113 = vmatprep.subr.mxu1 %v1500_v0  ;;  %1138 = vmatprep.subr.mxu0 %v1500_v0  ;;  %v668_v5 = vld [vmem:[#allocation6 + $0x1d8] sm:$0xff]  ;;  %v667_v6 = vld [vmem:[#allocation6 + $0x1d0] sm:$0xff]  ;;  %v666_v7 = vld [vmem:[#allocation6 + $0x1c8] sm:$0xff] }
  0x72   : > { %1114 = vmatpush3.msra.mxu1 %v375_v15  ;;  %1139 = vmatpush3.msra.mxu0 %v476_v26  ;;  %v665_v8 = vld [vmem:[#allocation6 + $0x1c0] sm:$0xff]  ;;  %v664_v9 = vld [vmem:[#allocation6 + $0x1b8] sm:$0xff]  ;;  %v663_v10 = vld [vmem:[#allocation6 + $0x1b0] sm:$0xff] }
  0x73   : > { %1115 = vmatprep.subr.mxu1 %v1500_v0  ;;  %1140 = vmatprep.subr.mxu0 %v1500_v0  ;;  %v662_v11 = vld [vmem:[#allocation6 + $0x1a8] sm:$0xff]  ;;  %v661_v12 = vld [vmem:[#allocation6 + $0x1a0] sm:$0xff]  ;;  %v660_v13 = vld [vmem:[#allocation6 + $0x198] sm:$0xff] }
  0x74   : > { %1116 = vmatpush3.msra.mxu1 %v374_v16  ;;  %1141 = vmatpush3.msra.mxu0 %v475_v27  ;;  %v982_v14 = vld [vmem:[%s1796_s4 + $0x2] ss:$0 sm:$0xff]  ;;  %v768_v22 = vld [vmem:[#allocation6 + $0x278] sm:$0xff]  ;;  %v766_v24 = vld [vmem:[#allocation6 + $0x268] sm:$0xff] }
  0x75   : > { %1117 = vmatprep.subr.mxu1 %v1500_v0  ;;  %1142 = vmatprep.subr.mxu0 %v1500_v0  ;;  %v767_v23 = vld [vmem:[#allocation6 + $0x270] sm:$0xff]  ;;  %v765_v25 = vld [vmem:[#allocation6 + $0x260] sm:$0xff]  ;;  %v764_v26 = vld [vmem:[#allocation6 + $0x258] sm:$0xff] }
  0x76   : > { %1118 = vmatpush3.msra.mxu1 %v373_v17  ;;  %1143 = vmatpush3.msra.mxu0 %v474_v28  ;;  %v763_v27 = vld [vmem:[#allocation6 + $0x250] sm:$0xff]  ;;  %v762_v28 = vld [vmem:[#allocation6 + $0x248] sm:$0xff] }
  0x77   : > { %1119 = vmatprep.subr.mxu1 %v1500_v0  ;;  %1144 = vmatprep.subr.mxu0 %v1500_v0 }
  0x78   : > { %1120 = vmatpush3.msra.mxu1 %v372_v18  ;;  %1145 = vmatpush3.msra.mxu0 %v473_v29  ;;  %v761_v29 = vld [vmem:[#allocation6 + $0x240] sm:$0xff] }
  0x79   : > { %1121 = vmatprep.subr.mxu1 %v1500_v0  ;;  %1146 = vmatprep.subr.mxu0 %v1500_v0 }
  0x7a   : > { %1122 = vmatpush3.msra.mxu1 %v371_v19  ;;  %1147 = vmatpush3.msra.mxu0 %v472_v30  ;;  %v659_v19 = vld [vmem:[#allocation6 + $0x190] sm:$0xff]  ;;  %v760_v30 = vld [vmem:[#allocation6 + $0x238] sm:$0xff] }
  0x7b   : > { %1123 = vmatprep.subr.mxu1 %v1500_v0  ;;  %1148 = vmatprep.subr.mxu0 %v1500_v0 }
  0x7c   : > { %1124 = vmatpush3.msra.mxu1 %v370_v20  ;;  %1149 = vmatpush3.msra.mxu0 %v471_v31  ;;  %v658_v20 = vld [vmem:[#allocation6 + $0x188] sm:$0xff]  ;;  %v759_v31 = vld [vmem:[#allocation6 + $0x230] sm:$0xff] }
  0x7d   : > { %1125 = vmatprep.subr.mxu1 %v1500_v0  ;;  %1150 = vmatprep.subr.mxu0 %v1500_v0 }
  0x7e   : > { %1126 = vmatpush3.msra.mxu1 %v369_v21  ;;  %1151 = vmatpush3.msra.mxu0 %v470_v32  ;;  %v657_v21 = vld [vmem:[#allocation6 + $0x180] sm:$0xff]  ;;  %v758_v32 = vld [vmem:[#allocation6 + $0x228] sm:$0xff] }
  0x7f   : > { %1165 = vmatprep.subr.mxu1 %v1500_v0  ;;  %1152 = vmatprep.subr.mxu0 %v1500_v0 }
  0x80   : > { %1153 = vmatpush3.msra.mxu0 %v469_v33  ;;  %v757_v33 = vld [vmem:[#allocation6 + $0x220] sm:$0xff] }
  0x81   : > { %1154 = vmatprep.subr.mxu0 %v1500_v0 }
  0x82   : > { %1155 = vmatpush3.msra.mxu0 %v468_v34  ;;  %v756_v34 = vld [vmem:[#allocation6 + $0x218] sm:$0xff] }
  0x83   : > { %1156 = vmatprep.subr.mxu0 %v1500_v0 }
  0x84   : > { %1157 = vmatpush3.msra.mxu0 %v467_v40  ;;  %v755_v40 = vld [vmem:[#allocation6 + $0x210] sm:$0xff] }
  0x85   : > { %1158 = vmatprep.subr.mxu0 %v1500_v0 }
  0x86   : > { %1159 = vmatpush3.msra.mxu0 %v466_v41  ;;  %v754_v41 = vld [vmem:[#allocation6 + $0x208] sm:$0xff] }
  0x87   : > { %1160 = vmatprep.subr.mxu0 %v1500_v0 }
  0x88   : > { %1161 = vmatpush3.msra.mxu0 %v465_v42  ;;  %v753_v42 = vld [vmem:[#allocation6 + $0x200] sm:$0xff] }
  0x89   : > { %1200 = vmatprep.subr.mxu0 %v1500_v0 }
 0x127   : > { %v364_v36 = vpop.f32.mrf.mxu0 }
 0x128   : > { %v365_v37 = vadd.f32 %v977_v35, %v364_v36  ;;  %v984_v35 = vld [vmem:[%s1796_s4 + $0x3] ss:$0 sm:$0xff] }
 0x129   : > { %v1094_v38 = vpop.f32.mrf.mxu0 }
 0x12a   : > { %v368_v39 = vmax.f32 %v365_v37, 0.0 }
 0x12c   : > { %1128 = vmatmul.mubr.f32.vlgmr.msra.gmra.mxu1 %v368_v39 }
 0x12d   : > { %1197 = vmatprep.mubr.msk.f32.mxu1 %vm1501_vm0, %v1500_v0  ;;  %1166 = vmatpush3.msra.mxu1 %v576_v43  ;;  %v986_v43 = vld [vmem:[%s1796_s4 + $0x4] ss:$0 sm:$0xff] }
 0x12e   : > { %1167 = vmatprep.subr.mxu1 %v1500_v0 }
 0x12f   : > { %1168 = vmatpush3.msra.mxu1 %v575_v44 }
 0x130   : > { %1169 = vmatprep.subr.mxu1 %v1500_v0 }
 0x131   : > { %1170 = vmatpush3.msra.mxu1 %v574_v45 }
 0x132   : > { %1171 = vmatprep.subr.mxu1 %v1500_v0 }
 0x133   : > { %1172 = vmatpush3.msra.mxu1 %v573_v46 }
 0x134   : > { %1173 = vmatprep.subr.mxu1 %v1500_v0 }
 0x135   : > { %1174 = vmatpush3.msra.mxu1 %v572_v47 }
 0x136   : > { %1175 = vmatprep.subr.mxu1 %v1500_v0 }
 0x137   : > { %1176 = vmatpush3.msra.mxu1 %v571_v48  ;;  %v988_v48 = vld [vmem:[%s1796_s4 + $0x5] ss:$0 sm:$0xff] }
 0x138   : > { %1177 = vmatprep.subr.mxu1 %v1500_v0 }
 0x139   : > { %1178 = vmatpush3.msra.mxu1 %v570_v49 }
 0x13a   : > { %1179 = vmatprep.subr.mxu1 %v1500_v0 }
 0x13b   : > { %1180 = vmatpush3.msra.mxu1 %v569_v50 }
 0x13c   : > { %1181 = vmatprep.subr.mxu1 %v1500_v0 }
 0x13d   : > { %1182 = vmatpush3.msra.mxu1 %v568_v51  ;;  %v990_v51 = vld [vmem:[#allocation7] ss:$0 sm:$0xff] }
 0x13e   : > { %1183 = vmatprep.subr.mxu1 %v1500_v0 }
 0x13f   : > { %1184 = vmatpush3.msra.mxu1 %v567_v52 }
 0x140   : > { %1185 = vmatprep.subr.mxu1 %v1500_v0 }
 0x141   : > { %1186 = vmatpush3.msra.mxu1 %v566_v53 }
 0x142   : > { %1187 = vmatprep.subr.mxu1 %v1500_v0 }
 0x143   : > { %1188 = vmatpush3.msra.mxu1 %v565_v54  ;;  %v991_v54 = vld [vmem:[%s1796_s4 + $0x6] ss:$0 sm:$0xff] }
 0x144   : > { %1189 = vmatprep.subr.mxu1 %v1500_v0 }
 0x145   : > { %1190 = vmatpush3.msra.mxu1 %v564_v55 }
 0x146   : > { %1191 = vmatprep.subr.mxu1 %v1500_v0 }
 0x147   : > { %1192 = vmatpush3.msra.mxu1 %v563_v61 }
 0x148   : > { %1193 = vmatprep.subr.mxu1 %v1500_v0 }
 0x149   : > { %1194 = vmatpush3.msra.mxu1 %v562_v62 }
 0x14a   : > { %1195 = vmatprep.subr.mxu1 %v1500_v0 }
 0x14b   : > { %1196 = vmatpush3.msra.mxu1 %v561_v63 }
 0x14c   : > { %1235 = vmatprep.subr.mxu1 %v1500_v0 }
 0x1ec   : > { %v459_v57 = vpop.f32.mrf.mxu1 }
 0x1ed   : > { %v460_v58 = vadd.f32 %v980_v56, %v459_v57 }
 0x1ee   : > { %v1129_v59 = vpop.f32.mrf.mxu1 }
 0x1ef   : > { %v463_v60 = vmax.f32 %v460_v58, 0.0 }
 0x1f1   : > { %1163 = vmatmul.mubr.f32.vlgmr.msra.gmra.mxu0 %v463_v60 }
 0x1f2   : > { %1232 = vmatprep.mubr.msk.f32.mxu0 %vm1501_vm0, %v1500_v0  ;;  %1201 = vmatpush3.msra.mxu0 %v672_v1 }
 0x1f3   : > { %1202 = vmatprep.subr.mxu0 %v1500_v0 }
 0x1f4   : > { %1203 = vmatpush3.msra.mxu0 %v671_v2 }
 0x1f5   : > { %1204 = vmatprep.subr.mxu0 %v1500_v0 }
 0x1f6   : > { %1205 = vmatpush3.msra.mxu0 %v670_v3 }
 0x1f7   : > { %1206 = vmatprep.subr.mxu0 %v1500_v0 }
 0x1f8   : > { %1207 = vmatpush3.msra.mxu0 %v669_v4 }
 0x1f9   : > { %1208 = vmatprep.subr.mxu0 %v1500_v0 }
 0x1fa   : > { %1209 = vmatpush3.msra.mxu0 %v668_v5 }
 0x1fb   : > { %1210 = vmatprep.subr.mxu0 %v1500_v0 }
 0x1fc   : > { %1211 = vmatpush3.msra.mxu0 %v667_v6 }
 0x1fd   : > { %1212 = vmatprep.subr.mxu0 %v1500_v0 }
 0x1fe   : > { %1213 = vmatpush3.msra.mxu0 %v666_v7 }
 0x1ff   : > { %1214 = vmatprep.subr.mxu0 %v1500_v0 }
 0x200   : > { %1215 = vmatpush3.msra.mxu0 %v665_v8 }
 0x201   : > { %1216 = vmatprep.subr.mxu0 %v1500_v0 }
 0x202   : > { %1217 = vmatpush3.msra.mxu0 %v664_v9 }
 0x203   : > { %1218 = vmatprep.subr.mxu0 %v1500_v0 }
 0x204   : > { %1219 = vmatpush3.msra.mxu0 %v663_v10 }
 0x205   : > { %1220 = vmatprep.subr.mxu0 %v1500_v0 }
 0x206   : > { %1221 = vmatpush3.msra.mxu0 %v662_v11 }
 0x207   : > { %1222 = vmatprep.subr.mxu0 %v1500_v0 }
 0x208   : > { %1223 = vmatpush3.msra.mxu0 %v661_v12 }
 0x209   : > { %1224 = vmatprep.subr.mxu0 %v1500_v0 }
 0x20a   : > { %1225 = vmatpush3.msra.mxu0 %v660_v13 }
 0x20b   : > { %1226 = vmatprep.subr.mxu0 %v1500_v0 }
 0x20c   : > { %1227 = vmatpush3.msra.mxu0 %v659_v19 }
 0x20d   : > { %1228 = vmatprep.subr.mxu0 %v1500_v0 }
 0x20e   : > { %1229 = vmatpush3.msra.mxu0 %v658_v20 }
 0x20f   : > { %1230 = vmatprep.subr.mxu0 %v1500_v0 }
 0x210   : > { %1231 = vmatpush3.msra.mxu0 %v657_v21 }
 0x2b1   : > { %v555_v15 = vpop.f32.mrf.mxu0 }
 0x2b2   : > { %v556_v16 = vadd.f32 %v982_v14, %v555_v15 }
 0x2b3   : > { %v1164_v17 = vpop.f32.mrf.mxu0 }
 0x2b4   : > { %v559_v18 = vmax.f32 %v556_v16, 0.0 }
 0x2b6   : > { %1198 = vmatmul.mubr.f32.vlgmr.msra.gmra.mxu1 %v559_v18 }
 0x2b7   : > { %1267 = vmatprep.mubr.msk.f32.mxu1 %vm1501_vm0, %v1500_v0  ;;  %1236 = vmatpush3.msra.mxu1 %v768_v22 }
 0x2b8   : > { %1237 = vmatprep.subr.mxu1 %v1500_v0 }
 0x2b9   : > { %1238 = vmatpush3.msra.mxu1 %v767_v23 }
 0x2ba   : > { %1239 = vmatprep.subr.mxu1 %v1500_v0 }
 0x2bb   : > { %1240 = vmatpush3.msra.mxu1 %v766_v24 }
 0x2bc   : > { %1241 = vmatprep.subr.mxu1 %v1500_v0 }
 0x2bd   : > { %1242 = vmatpush3.msra.mxu1 %v765_v25 }
 0x2be   : > { %1243 = vmatprep.subr.mxu1 %v1500_v0 }
 0x2bf   : > { %1244 = vmatpush3.msra.mxu1 %v764_v26 }
 0x2c0   : > { %1245 = vmatprep.subr.mxu1 %v1500_v0 }
 0x2c1   : > { %1246 = vmatpush3.msra.mxu1 %v763_v27 }
 0x2c2   : > { %1247 = vmatprep.subr.mxu1 %v1500_v0 }
 0x2c3   : > { %1248 = vmatpush3.msra.mxu1 %v762_v28 }
 0x2c4   : > { %1249 = vmatprep.subr.mxu1 %v1500_v0 }
 0x2c5   : > { %1250 = vmatpush3.msra.mxu1 %v761_v29 }
 0x2c6   : > { %1251 = vmatprep.subr.mxu1 %v1500_v0 }
 0x2c7   : > { %1252 = vmatpush3.msra.mxu1 %v760_v30 }
 0x2c8   : > { %1253 = vmatprep.subr.mxu1 %v1500_v0 }
 0x2c9   : > { %1254 = vmatpush3.msra.mxu1 %v759_v31 }
 0x2ca   : > { %1255 = vmatprep.subr.mxu1 %v1500_v0 }
 0x2cb   : > { %1256 = vmatpush3.msra.mxu1 %v758_v32 }
 0x2cc   : > { %1257 = vmatprep.subr.mxu1 %v1500_v0 }
 0x2cd   : > { %1258 = vmatpush3.msra.mxu1 %v757_v33 }
 0x2ce   : > { %1259 = vmatprep.subr.mxu1 %v1500_v0 }
 0x2cf   : > { %1260 = vmatpush3.msra.mxu1 %v756_v34 }
 0x2d0   : > { %1261 = vmatprep.subr.mxu1 %v1500_v0 }
 0x2d1   : > { %1262 = vmatpush3.msra.mxu1 %v755_v40 }
 0x2d2   : > { %1263 = vmatprep.subr.mxu1 %v1500_v0 }
 0x2d3   : > { %1264 = vmatpush3.msra.mxu1 %v754_v41 }
 0x2d4   : > { %1265 = vmatprep.subr.mxu1 %v1500_v0 }
 0x2d5   : > { %1266 = vmatpush3.msra.mxu1 %v753_v42 }
 0x376   : > { %v651_v36 = vpop.f32.mrf.mxu1 }
 0x377   : > { %v652_v37 = vadd.f32 %v984_v35, %v651_v36 }
 0x378   : > { %v1199_v38 = vpop.f32.mrf.mxu1 }
 0x379   : > { %v655_v39 = vmax.f32 %v652_v37, 0.0 }
 0x37b   : > { %1233 = vmatmul.mubr.f32.vlgmr.msra.gmra.mxu0 %v655_v39 }
 0x43b   : > { %v747_v44 = vpop.f32.mrf.mxu0 }
 0x43c   : > { %v748_v45 = vadd.f32 %v986_v43, %v747_v44 }
 0x43d   : > { %v1234_v46 = vpop.f32.mrf.mxu0 }
 0x43e   : > { %v751_v47 = vmax.f32 %v748_v45, 0.0 }
 0x440   : > { %1268 = vmatmul.mubr.f32.vlgmr.msra.gmra.mxu1 %v751_v47 }
 0x500   : > { %v843_v49 = vpop.f32.mrf.mxu1 }
 0x501   : > { %v844_v50 = vadd.f32 %v988_v48, %v843_v49 }
 0x502   : > { %v1269_v0 = vpop.f32.mrf.mxu1 }
 0x503   : > { %v847_v52 = vmax.f32 %v844_v50, 0.0 }
 0x505   : > { %v857_v53 = vmul.f32 %v990_v51, %v847_v52 }
 0x507   : > { %858 = vadd.xlane.f32.xlu0 %v857_v53 }
 0x590   : > { %v859_v55 = vpop.xlane.xlu0 %858 }
 0x591   : > { %v866_v56 = vadd.f32 %v991_v54, %v859_v55 }
 0x593   : > { %868 = vst.msk [vmem:[%s281_s8] sm:$0xff] %vm867_vm2, %v866_v56 }
 0x594 PF: > { %p17_p8 = scmp.ge.s32.totalorder %s1602_s25, 6   ;;  %s1811_s18 = smov %s1484_s19 }
 0x595   : > { %s1812_s19 = smov %s1488_s20  ;;  %s1813_s20 = smov %s1612_s27 }
 0x596   : > { %s1814_s21 = smov %s1602_s25  ;;  %19 = sbr.rel (!%p17_p8) target bundleno = 5 (0x5), region = 102 }
 0x59b   :  { %888 = vsyncpa [#allocation3], 1 }
 0x59c   :  { %890 = vsyncpa [#allocation3 + $0x1], 1 }
 0x59d   :  { %891 = vsyncpa [#allocation5], 1 }
 0x59e   :  { %892 = vsyncpa [#allocation8], 1 }

// kernel: tpu_custom_call.1
= control target key start
LH: loop header
LB: loop body
LE: loop exit
PB: predicated region body
PF: predicated region fallthrough
CT: control target
= control target key end

     0   :  { %10 = vsyncpa [#allocation3], 0  ;;  %s1792_s0 = inlined_call_operand.hbm [shape: f32[32,32], index: 0, kind: input, shape index: {}]   ;;  %s1793_s1 = inlined_call_operand.hbm [shape: f32[32,128], index: 1, kind: input, shape index: {}]   ;;  %s1794_s2 = inlined_call_operand.hbm [shape: f32[5,128,128], index: 2, kind: input, shape index: {}]   ;;  %s1795_s3 = inlined_call_operand.hbm [shape: f32[1,128], index: 3, kind: input, shape index: {}]   ;;  %s1796_s4 = inlined_call_operand.vmem [shape: f32[7,1,128], index: 4, kind: input, shape index: {}]   ;;  %s1797_s5 = inlined_call_operand.vmem [shape: f32[32,1], index: 5, kind: output, shape index: {}]  }
   0x1   :  { %12 = vsyncpa [#allocation3 + $0x1], 0 }
   0x2   :  { %13 = vsyncpa [#allocation5], 0 }
   0x3   :  { %14 = vsyncpa [#allocation8], 0  ;;  %s1532_s18 = smov 0   ;;  %s1534_s19 = smov 0  }
   0x4   :  { %s1536_s20 = smov 0   ;;  %s1538_s21 = smov 0  }
   0x5 LB: > { %s1551_s22 = sadd.s32 4294967295, %s1492_s21   ;;  %p40_p0 = scmp.ne.s32.totalorder %s1484_s19, %s1480_s18  ;;  %s1492_s21 = sphi %s1538_s21, %s1814_s21   ;;  %s1488_s20 = sphi %s1536_s20, %s1813_s20   ;;  %s1484_s19 = sphi %s1534_s19, %s1812_s19   ;;  %s1480_s18 = sphi %s1532_s18, %s1811_s18  }
   0x6   : > { %p1798_p1 = scmp.eq.s32.totalorder %s1551_s22, 0  ;;  %p964_p2 = scmp.ge.s32.totalorder %s1492_s21, 1 }
   0x7   : > { %p161_p3 = scmp.lt.s32.totalorder %s1492_s21, 5  ;;  %s1494_s25 = smov [#allocation4]  }
   0x8   : > { %p1559_p4 = por %p1798_p1, %p40_p0  ;;  %s173_s26 = sshll.u32 %s1494_s25, 4  ;;  %s174_s26 = int_to_ptr.vmem [resolvable:$true] %s173_s26 }
   0x9   : > { %p1563_p5 = pnand %p964_p2, %p161_p3  ;;  %s1495_s28 = smov [#allocation6]  }
   0xa   : > { %s1801_s23 = scalar_select %p1559_p4, 1, 0 }
   0xb   : > { %s1802_s24 = scalar_select %p1563_p5, 1, 0 }
   0xc   : > { %p1284_p6 = pneg %p1563_p5  ;;  %s186_s29 = sshll.u32 %s1495_s28, 4  ;;  %s187_s29 = int_to_ptr.vmem [resolvable:$true] %s186_s29 }
   0xd   : > { %s1496_s30 = smov [#allocation7]   ;;  %s1355_s7 = scalar_lea.vmem %s174_s26, 512 }
   0xe   : > { %p1571_p7 = pnand %p1284_p6, %p1798_p1  ;;  %s200_s6 = sshll.u32 %s1496_s30, 4  ;;  %s201_s6 = int_to_ptr.vmem [resolvable:$true] %s200_s6 }
   0xf   : > { %p1356_p9 = scmp.ne.s32.totalorder %s174_s26, %s1355_s7  ;;  %p1363_p12 = scmp.lt.s32.totalorder %s174_s26, %s174_s26 }
  0x10   : > { %p1346_p8 = pneg %p1571_p7  ;;  %p1364_p13 = scmp.lt.s32.totalorder %s1355_s7, %s1355_s7 }
  0x12   : > { %p1358_p10 = pnand %p1356_p9, %p1346_p8  ;;  %p1365_p0 = por %p1364_p13, %p1363_p12 }
  0x14   : > { %p1359_p11 = pneg %p1358_p10 }
  0x16   : > { %p1366_p2 = pnand %p1365_p0, %p1359_p11 }
  0x18   : > { %1369 = shalt.err (!%p1366_p2)
}
  0x19   : > { %s1497_s8 = smov 128   ;;  %s1498_s9 = smov 8  }
  0x1a   : > { %1287 = dma.hbm_to_vmem [thread:$0]  (!%p1571_p7), %s1793_s1, 512, %s174_s26, [#allocation5], %s1497_s8, %s1497_s8, %s1498_s9  }
  0x1b   : > { %s1381_s12 = scalar_lea.vmem %s187_s29, 10240  ;;  %p1389_p10 = scmp.lt.s32.totalorder %s187_s29, %s187_s29 }
  0x1c   : > { %p1382_p3 = scmp.ne.s32.totalorder %s187_s29, %s1381_s12  ;;  %p1390_p1 = scmp.lt.s32.totalorder %s1381_s12, %s1381_s12 }
  0x1e   : > { %p1384_p6 = pnand %p1382_p3, %p1346_p8  ;;  %p1391_p12 = por %p1390_p1, %p1389_p10 }
  0x20   : > { %p1385_p9 = pneg %p1384_p6 }
  0x22   : > { %p1392_p11 = pnand %p1391_p12, %p1385_p9 }
  0x24   : > { %1395 = shalt.err (!%p1392_p11)
}
  0x25   : > { %1290 = dma.hbm_to_vmem [thread:$0]  (!%p1571_p7), %s1794_s2, 10240, %s187_s29, [#allocation5], %s1497_s8, %s1497_s8, %s1498_s9  }
  0x26   : > { %s1407_s15 = scalar_lea.vmem %s201_s6, 16  ;;  %s1414_s16 = scalar_lea.vmem %s201_s6, 32 }
  0x27   : > { %p1408_p13 = scmp.ne.s32.totalorder %s201_s6, %s1407_s15  ;;  %p1415_p3 = scmp.lt.s32.totalorder %s201_s6, %s201_s6 }
  0x28   : > { %p1416_p6 = scmp.lt.s32.totalorder %s1414_s16, %s1407_s15 }
  0x29   : > { %p1410_p0 = pnand %p1408_p13, %p1346_p8 }
  0x2a   : > { %p1417_p1 = por %p1416_p6, %p1415_p3 }
  0x2b   : > { %p1411_p2 = pneg %p1410_p0 }
  0x2d   : > { %p1418_p9 = pnand %p1417_p1, %p1411_p2 }
  0x2f   : > { %1421 = shalt.err (!%p1418_p9)
}
  0x30   : > { %1293 = dma.hbm_to_vmem [thread:$0]  (!%p1571_p7), %s1795_s3, 16, %s201_s6, [#allocation8]  }
  0x31   : > { %s1602_s25 = sadd.s32 1, %s1492_s21   ;;  %s27_s28 = sadd.s32 1, %s1488_s20 }
  0x32   : > { %s24_s26 = ssub.s32 %s1492_s21, %s1602_s25  ;;  %p34_p10 = scmp.ne.s32.totalorder %s1488_s20, %s1484_s19 }
  0x33   : > { %p25_p8 = scmp.eq.s32.totalorder %s24_s26, 0  ;;  %p35_p12 = scmp.eq.s32.totalorder %s1492_s21, 0 }
  0x34   : > { %p1301_p11 = scmp.lt.s32.totalorder %s1492_s21, 4  ;;  %s214_s29 = sand.u32 1, %s1488_s20  }
  0x35   : > { %s1612_s27 = scalar_select %p25_p8, %s1488_s20, %s27_s28  }
  0x36   : > { %p36_p13 = por %p35_p12, %p34_p10  ;;  %s969_s30 = sshll.u32 %s214_s29, 3 }
  0x37   : > { %s970_s7 = sshll.u32 %s1492_s21, 7  ;;  %s218_s6 = scalar_lea.vmem [#allocation2], %s969_s30 }
  0x38   : > { %s1619_s10 = scalar_lea.hbm %s1792_s0, %s970_s7  ;;  %s225_s11 = sshll.u32 %s218_s6, 4  ;;  %s226_s11 = int_to_ptr.vmem [resolvable:$true] %s225_s11 }
  0x39   : > { %p1621_p7 = pnand %p1301_p11, %p36_p13  ;;  %s215_s13 = scalar_lea.sflag [#allocation3], %s214_s29 }
  0x3a   : > { %s1422_s14 = scalar_lea.hbm %s1619_s10, 128  ;;  %s1427_s16 = scalar_lea.hbm %s1792_s0, 512 }
  0x3b   : > { %p1423_p0 = scmp.ne.s32.totalorder %s1619_s10, %s1422_s14  ;;  %p1424_p2 = pneg %p1621_p7 }
  0x3c   : > { %p1428_p1 = scmp.lt.s32.totalorder %s1619_s10, %s1792_s0  ;;  %p1429_p9 = scmp.lt.s32.totalorder %s1427_s16, %s1422_s14 }
  0x3d   : > { %p1425_p3 = pnand %p1424_p2, %p1423_p0 }
  0x3e   : > { %p1430_p8 = por %p1429_p9, %p1428_p1 }
  0x3f   : > { %p1426_p6 = pneg %p1425_p3 }
  0x41   : > { %p1431_p10 = pnand %p1430_p8, %p1426_p6 }
  0x43   : > { %1434 = shalt.err (!%p1431_p10)
}
  0x44   : > { %s1435_s26 = scalar_lea.vmem %s226_s11, 128  ;;  %s1499_s28 = smov [#allocation2]  }
  0x45   : > { %p1436_p12 = scmp.ne.s32.totalorder %s226_s11, %s1435_s26  ;;  %s1440_s29 = sshll.u32 %s1499_s28, 4  ;;  %s1441_s29 = int_to_ptr.vmem [resolvable:$false] %s1440_s29 }
  0x46   : > { %s1442_s30 = scalar_lea.vmem %s1441_s29, 256  ;;  %p1443_p0 = scmp.lt.s32.totalorder %s226_s11, %s1441_s29 }
  0x47   : > { %p1438_p11 = pnand %p1436_p12, %p1424_p2  ;;  %p1444_p3 = scmp.lt.s32.totalorder %s1442_s30, %s1435_s26 }
  0x49   : > { %p1439_p13 = pneg %p1438_p11  ;;  %p1445_p4 = por %p1444_p3, %p1443_p0 }
  0x4b   : > { %p1446_p5 = pnand %p1445_p4, %p1439_p13 }
  0x4d   : > { %1449 = shalt.err (!%p1446_p5)
}
  0x4e   : > { %1297 = dma.hbm_to_vmem [thread:$0]  (!%p1621_p7), %s1619_s10, 128, %s226_s11, %s215_s13  }
  0x4f   : > { %p1805_p6 = scmp.ne.s32.totalorder %s1802_s24, 0 }
  0x50   : > { %s236_s7 = sand.u32 (!%p1805_p6), 1, %s1484_s19   ;;  %p1806_p2 = scmp.ne.s32.totalorder (!%p1805_p6), %s1801_s23, 0 }
  0x51   : > { %234 = sbr.rel (%p1805_p6) target bundleno = 1428 (0x594), region = 40  ;;  %s1642_s8 = sshll.u32 (!%p1805_p6), %s236_s7, 3 }
  0x52   : > { %s237_s9 = scalar_lea.sflag (!%p1805_p6), [#allocation3], %s236_s7  ;;  %s240_s6 = scalar_lea.vmem (!%p1805_p6), [#allocation2], %s1642_s8 }
  0x56   : > { %1467 = dma.done.wait (%p1806_p2), %s237_s9, 128  }
  0x57   : > { %1469 = vsyncadd (%p1806_p2), %s237_s9, 4294967168  ;;  %p1807_p4 = scmp.eq.s32.totalorder %s1551_s22, 0 }
  0x59   : > { %1471 = dma.done.wait (%p1807_p4), [#allocation5], 10752   ;;  %p1808_p5 = pmov %p1807_p4 }
  0x5a   : > { %p1809_p7 = pmov %p1807_p4 }
  0x5b   : > { %1473 = vsyncadd (%p1808_p5), [#allocation5], 4294956544 }
  0x5c   : > { %1475 = dma.done.wait (%p1809_p7), [#allocation8], 16   ;;  %p1810_p1 = pmov %p1807_p4 }
  0x5d   : > { %v1500_v0 = vmov 0.0   ;;  %vm1501_vm0 = vmmov 0   ;;  %v285_v1 = vld [vmem:[#allocation4 + $0x18] sm:$0xff]  ;;  %v284_v2 = vld [vmem:[#allocation4 + $0x10] sm:$0xff]  ;;  %v283_v4 = vld [vmem:[#allocation4 + $0x8] sm:$0xff]  ;;  %vm294_vm1 = vcmask 261120  }
  0x5e   : > { %1477 = vsyncadd (%p1810_p1), [#allocation8], 4294967280  ;;  %1084 = vmatprep.subr.mxu0 %v1500_v0  ;;  %1092 = vmatprep.mubr.msk.f32.mxu0 %vm1501_vm0, %v1500_v0  ;;  %v384_v3 = vld [vmem:[#allocation6 + $0x78] sm:$0xff]  ;;  %v383_v5 = vld [vmem:[#allocation6 + $0x70] sm:$0xff]  ;;  %p278_p9 = scmp.lt.s32.totalorder %s1551_s22, 3  ;;  %vm867_vm2 = vcmask 7168  }
  0x5f   : > { %1095 = vmatprep.subr.mxu1 %v1500_v0  ;;  %1127 = vmatprep.mubr.msk.f32.mxu1 %vm1501_vm0, %v1500_v0  ;;  %v382_v6 = vld [vmem:[#allocation6 + $0x68] sm:$0xff]  ;;  %v282_v7 = vld [vmem:[#allocation4] sm:$0xff]  ;;  %v286_v8 = vld [vmem:[%s240_s6] sm:$0xff] }
  0x60   : > { %1085 = vmatpush3.msra.mxu0 %v285_v1  ;;  %1096 = vmatpush3.msra.mxu1 %v384_v3  ;;  %v381_v9 = vld [vmem:[#allocation6 + $0x60] sm:$0xff]  ;;  %v380_v10 = vld [vmem:[#allocation6 + $0x58] sm:$0xff]  ;;  %v379_v11 = vld [vmem:[#allocation6 + $0x50] sm:$0xff]  ;;  %s1816_s22 = smov (!%p278_p9, %s1551_s22), 3 }
  0x61   : > { %1086 = vmatprep.subr.mxu0 %v1500_v0  ;;  %1097 = vmatprep.subr.mxu1 %v1500_v0  ;;  %v378_v12 = vld [vmem:[#allocation6 + $0x48] sm:$0xff]  ;;  %v377_v13 = vld [vmem:[#allocation6 + $0x40] sm:$0xff]  ;;  %v376_v14 = vld [vmem:[#allocation6 + $0x38] sm:$0xff]  ;;  %s976_s26 = sshll.u32 %s1816_s22, 3 }
  0x62   : > { %1087 = vmatpush3.msra.mxu0 %v284_v2  ;;  %1098 = vmatpush3.msra.mxu1 %v383_v5  ;;  %v375_v15 = vld [vmem:[#allocation6 + $0x30] sm:$0xff]  ;;  %v374_v16 = vld [vmem:[#allocation6 + $0x28] sm:$0xff]  ;;  %v373_v17 = vld [vmem:[#allocation6 + $0x20] sm:$0xff]  ;;  %s281_s8 = scalar_lea.vmem %s1797_s5, %s976_s26 }
  0x63   : > { %1088 = vmatprep.subr.mxu0 %v1500_v0  ;;  %1099 = vmatprep.subr.mxu1 %v1500_v0  ;;  %v372_v18 = vld [vmem:[#allocation6 + $0x18] sm:$0xff]  ;;  %v371_v19 = vld [vmem:[#allocation6 + $0x10] sm:$0xff]  ;;  %v370_v20 = vld [vmem:[#allocation6 + $0x8] sm:$0xff] }
  0x64   : > { %1089 = vmatpush3.msra.mxu0 %v283_v4  ;;  %1100 = vmatpush3.msra.mxu1 %v382_v6  ;;  %v369_v21 = vld [vmem:[#allocation6] sm:$0xff]  ;;  %v480_v22 = vld [vmem:[#allocation6 + $0xf8] sm:$0xff]  ;;  %v479_v23 = vld [vmem:[#allocation6 + $0xf0] sm:$0xff] }
  0x65   : > { %1090 = vmatprep.subr.mxu0 %v1500_v0  ;;  %1101 = vmatprep.subr.mxu1 %v1500_v0  ;;  %v478_v24 = vld [vmem:[#allocation6 + $0xe8] sm:$0xff]  ;;  %v477_v25 = vld [vmem:[#allocation6 + $0xe0] sm:$0xff]  ;;  %v476_v26 = vld [vmem:[#allocation6 + $0xd8] sm:$0xff] }
  0x66   : > { %1091 = vmatpush3.msra.mxu0 %v282_v7  ;;  %1102 = vmatpush3.msra.mxu1 %v381_v9  ;;  %v475_v27 = vld [vmem:[#allocation6 + $0xd0] sm:$0xff]  ;;  %v474_v28 = vld [vmem:[#allocation6 + $0xc8] sm:$0xff]  ;;  %v473_v29 = vld [vmem:[#allocation6 + $0xc0] sm:$0xff] }
  0x67   : > { %1093 = vmatmul.mubr.msk.f32.vlgmr.msra.gmra.mxu0 %vm294_vm1, %v286_v8  ;;  %1103 = vmatprep.subr.mxu1 %v1500_v0  ;;  %v472_v30 = vld [vmem:[#allocation6 + $0xb8] sm:$0xff]  ;;  %v471_v31 = vld [vmem:[#allocation6 + $0xb0] sm:$0xff]  ;;  %v470_v32 = vld [vmem:[#allocation6 + $0xa8] sm:$0xff] }
  0x68   : > { %1130 = vmatprep.subr.mxu0 %v1500_v0  ;;  %1104 = vmatpush3.msra.mxu1 %v380_v10  ;;  %v469_v33 = vld [vmem:[#allocation6 + $0xa0] sm:$0xff]  ;;  %v468_v34 = vld [vmem:[#allocation6 + $0x98] sm:$0xff]  ;;  %v977_v35 = vld [vmem:[%s1796_s4] ss:$0 sm:$0xff] }
  0x69   : > { %1162 = vmatprep.mubr.msk.f32.mxu0 %vm1501_vm0, %v1500_v0  ;;  %1105 = vmatprep.subr.mxu1 %v1500_v0  ;;  %v467_v40 = vld [vmem:[#allocation6 + $0x90] sm:$0xff]  ;;  %v466_v41 = vld [vmem:[#allocation6 + $0x88] sm:$0xff]  ;;  %v465_v42 = vld [vmem:[#allocation6 + $0x80] sm:$0xff] }
  0x6a   : > { %1106 = vmatpush3.msra.mxu1 %v379_v11  ;;  %1131 = vmatpush3.msra.mxu0 %v480_v22  ;;  %v576_v43 = vld [vmem:[#allocation6 + $0x178] sm:$0xff]  ;;  %v575_v44 = vld [vmem:[#allocation6 + $0x170] sm:$0xff]  ;;  %v574_v45 = vld [vmem:[#allocation6 + $0x168] sm:$0xff] }
  0x6b   : > { %1107 = vmatprep.subr.mxu1 %v1500_v0  ;;  %1132 = vmatprep.subr.mxu0 %v1500_v0  ;;  %v573_v46 = vld [vmem:[#allocation6 + $0x160] sm:$0xff]  ;;  %v572_v47 = vld [vmem:[#allocation6 + $0x158] sm:$0xff]  ;;  %v571_v48 = vld [vmem:[#allocation6 + $0x150] sm:$0xff] }
  0x6c   : > { %1108 = vmatpush3.msra.mxu1 %v378_v12  ;;  %1133 = vmatpush3.msra.mxu0 %v479_v23  ;;  %v570_v49 = vld [vmem:[#allocation6 + $0x148] sm:$0xff]  ;;  %v569_v50 = vld [vmem:[#allocation6 + $0x140] sm:$0xff]  ;;  %v568_v51 = vld [vmem:[#allocation6 + $0x138] sm:$0xff] }
  0x6d   : > { %1109 = vmatprep.subr.mxu1 %v1500_v0  ;;  %1134 = vmatprep.subr.mxu0 %v1500_v0  ;;  %v567_v52 = vld [vmem:[#allocation6 + $0x130] sm:$0xff]  ;;  %v566_v53 = vld [vmem:[#allocation6 + $0x128] sm:$0xff]  ;;  %v565_v54 = vld [vmem:[#allocation6 + $0x120] sm:$0xff] }
  0x6e   : > { %1110 = vmatpush3.msra.mxu1 %v377_v13  ;;  %1135 = vmatpush3.msra.mxu0 %v478_v24  ;;  %v564_v55 = vld [vmem:[#allocation6 + $0x118] sm:$0xff]  ;;  %v980_v56 = vld [vmem:[%s1796_s4 + $0x1] ss:$0 sm:$0xff]  ;;  %v562_v62 = vld [vmem:[#allocation6 + $0x108] sm:$0xff] }
  0x6f   : > { %1111 = vmatprep.subr.mxu1 %v1500_v0  ;;  %1136 = vmatprep.subr.mxu0 %v1500_v0  ;;  %v563_v61 = vld [vmem:[#allocation6 + $0x110] sm:$0xff]  ;;  %v561_v63 = vld [vmem:[#allocation6 + $0x100] sm:$0xff]  ;;  %v672_v1 = vld [vmem:[#allocation6 + $0x1f8] sm:$0xff] }
  0x70   : > { %1112 = vmatpush3.msra.mxu1 %v376_v14  ;;  %1137 = vmatpush3.msra.mxu0 %v477_v25  ;;  %v671_v2 = vld [vmem:[#allocation6 + $0x1f0] sm:$0xff]  ;;  %v670_v3 = vld [vmem:[#allocation6 + $0x1e8] sm:$0xff]  ;;  %v669_v4 = vld [vmem:[#allocation6 + $0x1e0] sm:$0xff] }
  0x71   : > { %1113 = vmatprep.subr.mxu1 %v1500_v0  ;;  %1138 = vmatprep.subr.mxu0 %v1500_v0  ;;  %v668_v5 = vld [vmem:[#allocation6 + $0x1d8] sm:$0xff]  ;;  %v667_v6 = vld [vmem:[#allocation6 + $0x1d0] sm:$0xff]  ;;  %v666_v7 = vld [vmem:[#allocation6 + $0x1c8] sm:$0xff] }
  0x72   : > { %1114 = vmatpush3.msra.mxu1 %v375_v15  ;;  %1139 = vmatpush3.msra.mxu0 %v476_v26  ;;  %v665_v8 = vld [vmem:[#allocation6 + $0x1c0] sm:$0xff]  ;;  %v664_v9 = vld [vmem:[#allocation6 + $0x1b8] sm:$0xff]  ;;  %v663_v10 = vld [vmem:[#allocation6 + $0x1b0] sm:$0xff] }
  0x73   : > { %1115 = vmatprep.subr.mxu1 %v1500_v0  ;;  %1140 = vmatprep.subr.mxu0 %v1500_v0  ;;  %v662_v11 = vld [vmem:[#allocation6 + $0x1a8] sm:$0xff]  ;;  %v661_v12 = vld [vmem:[#allocation6 + $0x1a0] sm:$0xff]  ;;  %v660_v13 = vld [vmem:[#allocation6 + $0x198] sm:$0xff] }
  0x74   : > { %1116 = vmatpush3.msra.mxu1 %v374_v16  ;;  %1141 = vmatpush3.msra.mxu0 %v475_v27  ;;  %v982_v14 = vld [vmem:[%s1796_s4 + $0x2] ss:$0 sm:$0xff]  ;;  %v768_v22 = vld [vmem:[#allocation6 + $0x278] sm:$0xff]  ;;  %v766_v24 = vld [vmem:[#allocation6 + $0x268] sm:$0xff] }
  0x75   : > { %1117 = vmatprep.subr.mxu1 %v1500_v0  ;;  %1142 = vmatprep.subr.mxu0 %v1500_v0  ;;  %v767_v23 = vld [vmem:[#allocation6 + $0x270] sm:$0xff]  ;;  %v765_v25 = vld [vmem:[#allocation6 + $0x260] sm:$0xff]  ;;  %v764_v26 = vld [vmem:[#allocation6 + $0x258] sm:$0xff] }
  0x76   : > { %1118 = vmatpush3.msra.mxu1 %v373_v17  ;;  %1143 = vmatpush3.msra.mxu0 %v474_v28  ;;  %v763_v27 = vld [vmem:[#allocation6 + $0x250] sm:$0xff]  ;;  %v762_v28 = vld [vmem:[#allocation6 + $0x248] sm:$0xff] }
  0x77   : > { %1119 = vmatprep.subr.mxu1 %v1500_v0  ;;  %1144 = vmatprep.subr.mxu0 %v1500_v0 }
  0x78   : > { %1120 = vmatpush3.msra.mxu1 %v372_v18  ;;  %1145 = vmatpush3.msra.mxu0 %v473_v29  ;;  %v761_v29 = vld [vmem:[#allocation6 + $0x240] sm:$0xff] }
  0x79   : > { %1121 = vmatprep.subr.mxu1 %v1500_v0  ;;  %1146 = vmatprep.subr.mxu0 %v1500_v0 }
  0x7a   : > { %1122 = vmatpush3.msra.mxu1 %v371_v19  ;;  %1147 = vmatpush3.msra.mxu0 %v472_v30  ;;  %v659_v19 = vld [vmem:[#allocation6 + $0x190] sm:$0xff]  ;;  %v760_v30 = vld [vmem:[#allocation6 + $0x238] sm:$0xff] }
  0x7b   : > { %1123 = vmatprep.subr.mxu1 %v1500_v0  ;;  %1148 = vmatprep.subr.mxu0 %v1500_v0 }
  0x7c   : > { %1124 = vmatpush3.msra.mxu1 %v370_v20  ;;  %1149 = vmatpush3.msra.mxu0 %v471_v31  ;;  %v658_v20 = vld [vmem:[#allocation6 + $0x188] sm:$0xff]  ;;  %v759_v31 = vld [vmem:[#allocation6 + $0x230] sm:$0xff] }
  0x7d   : > { %1125 = vmatprep.subr.mxu1 %v1500_v0  ;;  %1150 = vmatprep.subr.mxu0 %v1500_v0 }
  0x7e   : > { %1126 = vmatpush3.msra.mxu1 %v369_v21  ;;  %1151 = vmatpush3.msra.mxu0 %v470_v32  ;;  %v657_v21 = vld [vmem:[#allocation6 + $0x180] sm:$0xff]  ;;  %v758_v32 = vld [vmem:[#allocation6 + $0x228] sm:$0xff] }
  0x7f   : > { %1165 = vmatprep.subr.mxu1 %v1500_v0  ;;  %1152 = vmatprep.subr.mxu0 %v1500_v0 }
  0x80   : > { %1153 = vmatpush3.msra.mxu0 %v469_v33  ;;  %v757_v33 = vld [vmem:[#allocation6 + $0x220] sm:$0xff] }
  0x81   : > { %1154 = vmatprep.subr.mxu0 %v1500_v0 }
  0x82   : > { %1155 = vmatpush3.msra.mxu0 %v468_v34  ;;  %v756_v34 = vld [vmem:[#allocation6 + $0x218] sm:$0xff] }
  0x83   : > { %1156 = vmatprep.subr.mxu0 %v1500_v0 }
  0x84   : > { %1157 = vmatpush3.msra.mxu0 %v467_v40  ;;  %v755_v40 = vld [vmem:[#allocation6 + $0x210] sm:$0xff] }
  0x85   : > { %1158 = vmatprep.subr.mxu0 %v1500_v0 }
  0x86   : > { %1159 = vmatpush3.msra.mxu0 %v466_v41  ;;  %v754_v41 = vld [vmem:[#allocation6 + $0x208] sm:$0xff] }
  0x87   : > { %1160 = vmatprep.subr.mxu0 %v1500_v0 }
  0x88   : > { %1161 = vmatpush3.msra.mxu0 %v465_v42  ;;  %v753_v42 = vld [vmem:[#allocation6 + $0x200] sm:$0xff] }
  0x89   : > { %1200 = vmatprep.subr.mxu0 %v1500_v0 }
 0x127   : > { %v364_v36 = vpop.f32.mrf.mxu0 }
 0x128   : > { %v365_v37 = vadd.f32 %v977_v35, %v364_v36  ;;  %v984_v35 = vld [vmem:[%s1796_s4 + $0x3] ss:$0 sm:$0xff] }
 0x129   : > { %v1094_v38 = vpop.f32.mrf.mxu0 }
 0x12a   : > { %v368_v39 = vmax.f32 %v365_v37, 0.0 }
 0x12c   : > { %1128 = vmatmul.mubr.f32.vlgmr.msra.gmra.mxu1 %v368_v39 }
 0x12d   : > { %1197 = vmatprep.mubr.msk.f32.mxu1 %vm1501_vm0, %v1500_v0  ;;  %1166 = vmatpush3.msra.mxu1 %v576_v43  ;;  %v986_v43 = vld [vmem:[%s1796_s4 + $0x4] ss:$0 sm:$0xff] }
 0x12e   : > { %1167 = vmatprep.subr.mxu1 %v1500_v0 }
 0x12f   : > { %1168 = vmatpush3.msra.mxu1 %v575_v44 }
 0x130   : > { %1169 = vmatprep.subr.mxu1 %v1500_v0 }
 0x131   : > { %1170 = vmatpush3.msra.mxu1 %v574_v45 }
 0x132   : > { %1171 = vmatprep.subr.mxu1 %v1500_v0 }
 0x133   : > { %1172 = vmatpush3.msra.mxu1 %v573_v46 }
 0x134   : > { %1173 = vmatprep.subr.mxu1 %v1500_v0 }
 0x135   : > { %1174 = vmatpush3.msra.mxu1 %v572_v47 }
 0x136   : > { %1175 = vmatprep.subr.mxu1 %v1500_v0 }
 0x137   : > { %1176 = vmatpush3.msra.mxu1 %v571_v48  ;;  %v988_v48 = vld [vmem:[%s1796_s4 + $0x5] ss:$0 sm:$0xff] }
 0x138   : > { %1177 = vmatprep.subr.mxu1 %v1500_v0 }
 0x139   : > { %1178 = vmatpush3.msra.mxu1 %v570_v49 }
 0x13a   : > { %1179 = vmatprep.subr.mxu1 %v1500_v0 }
 0x13b   : > { %1180 = vmatpush3.msra.mxu1 %v569_v50 }
 0x13c   : > { %1181 = vmatprep.subr.mxu1 %v1500_v0 }
 0x13d   : > { %1182 = vmatpush3.msra.mxu1 %v568_v51  ;;  %v990_v51 = vld [vmem:[#allocation7] ss:$0 sm:$0xff] }
 0x13e   : > { %1183 = vmatprep.subr.mxu1 %v1500_v0 }
 0x13f   : > { %1184 = vmatpush3.msra.mxu1 %v567_v52 }
 0x140   : > { %1185 = vmatprep.subr.mxu1 %v1500_v0 }
 0x141   : > { %1186 = vmatpush3.msra.mxu1 %v566_v53 }
 0x142   : > { %1187 = vmatprep.subr.mxu1 %v1500_v0 }
 0x143   : > { %1188 = vmatpush3.msra.mxu1 %v565_v54  ;;  %v991_v54 = vld [vmem:[%s1796_s4 + $0x6] ss:$0 sm:$0xff] }
 0x144   : > { %1189 = vmatprep.subr.mxu1 %v1500_v0 }
 0x145   : > { %1190 = vmatpush3.msra.mxu1 %v564_v55 }
 0x146   : > { %1191 = vmatprep.subr.mxu1 %v1500_v0 }
 0x147   : > { %1192 = vmatpush3.msra.mxu1 %v563_v61 }
 0x148   : > { %1193 = vmatprep.subr.mxu1 %v1500_v0 }
 0x149   : > { %1194 = vmatpush3.msra.mxu1 %v562_v62 }
 0x14a   : > { %1195 = vmatprep.subr.mxu1 %v1500_v0 }
 0x14b   : > { %1196 = vmatpush3.msra.mxu1 %v561_v63 }
 0x14c   : > { %1235 = vmatprep.subr.mxu1 %v1500_v0 }
 0x1ec   : > { %v459_v57 = vpop.f32.mrf.mxu1 }
 0x1ed   : > { %v460_v58 = vadd.f32 %v980_v56, %v459_v57 }
 0x1ee   : > { %v1129_v59 = vpop.f32.mrf.mxu1 }
 0x1ef   : > { %v463_v60 = vmax.f32 %v460_v58, 0.0 }
 0x1f1   : > { %1163 = vmatmul.mubr.f32.vlgmr.msra.gmra.mxu0 %v463_v60 }
 0x1f2   : > { %1232 = vmatprep.mubr.msk.f32.mxu0 %vm1501_vm0, %v1500_v0  ;;  %1201 = vmatpush3.msra.mxu0 %v672_v1 }
 0x1f3   : > { %1202 = vmatprep.subr.mxu0 %v1500_v0 }
 0x1f4   : > { %1203 = vmatpush3.msra.mxu0 %v671_v2 }
 0x1f5   : > { %1204 = vmatprep.subr.mxu0 %v1500_v0 }
 0x1f6   : > { %1205 = vmatpush3.msra.mxu0 %v670_v3 }
 0x1f7   : > { %1206 = vmatprep.subr.mxu0 %v1500_v0 }
 0x1f8   : > { %1207 = vmatpush3.msra.mxu0 %v669_v4 }
 0x1f9   : > { %1208 = vmatprep.subr.mxu0 %v1500_v0 }
 0x1fa   : > { %1209 = vmatpush3.msra.mxu0 %v668_v5 }
 0x1fb   : > { %1210 = vmatprep.subr.mxu0 %v1500_v0 }
 0x1fc   : > { %1211 = vmatpush3.msra.mxu0 %v667_v6 }
 0x1fd   : > { %1212 = vmatprep.subr.mxu0 %v1500_v0 }
 0x1fe   : > { %1213 = vmatpush3.msra.mxu0 %v666_v7 }
 0x1ff   : > { %1214 = vmatprep.subr.mxu0 %v1500_v0 }
 0x200   : > { %1215 = vmatpush3.msra.mxu0 %v665_v8 }
 0x201   : > { %1216 = vmatprep.subr.mxu0 %v1500_v0 }
 0x202   : > { %1217 = vmatpush3.msra.mxu0 %v664_v9 }
 0x203   : > { %1218 = vmatprep.subr.mxu0 %v1500_v0 }
 0x204   : > { %1219 = vmatpush3.msra.mxu0 %v663_v10 }
 0x205   : > { %1220 = vmatprep.subr.mxu0 %v1500_v0 }
 0x206   : > { %1221 = vmatpush3.msra.mxu0 %v662_v11 }
 0x207   : > { %1222 = vmatprep.subr.mxu0 %v1500_v0 }
 0x208   : > { %1223 = vmatpush3.msra.mxu0 %v661_v12 }
 0x209   : > { %1224 = vmatprep.subr.mxu0 %v1500_v0 }
 0x20a   : > { %1225 = vmatpush3.msra.mxu0 %v660_v13 }
 0x20b   : > { %1226 = vmatprep.subr.mxu0 %v1500_v0 }
 0x20c   : > { %1227 = vmatpush3.msra.mxu0 %v659_v19 }
 0x20d   : > { %1228 = vmatprep.subr.mxu0 %v1500_v0 }
 0x20e   : > { %1229 = vmatpush3.msra.mxu0 %v658_v20 }
 0x20f   : > { %1230 = vmatprep.subr.mxu0 %v1500_v0 }
 0x210   : > { %1231 = vmatpush3.msra.mxu0 %v657_v21 }
 0x2b1   : > { %v555_v15 = vpop.f32.mrf.mxu0 }
 0x2b2   : > { %v556_v16 = vadd.f32 %v982_v14, %v555_v15 }
 0x2b3   : > { %v1164_v17 = vpop.f32.mrf.mxu0 }
 0x2b4   : > { %v559_v18 = vmax.f32 %v556_v16, 0.0 }
 0x2b6   : > { %1198 = vmatmul.mubr.f32.vlgmr.msra.gmra.mxu1 %v559_v18 }
 0x2b7   : > { %1267 = vmatprep.mubr.msk.f32.mxu1 %vm1501_vm0, %v1500_v0  ;;  %1236 = vmatpush3.msra.mxu1 %v768_v22 }
 0x2b8   : > { %1237 = vmatprep.subr.mxu1 %v1500_v0 }
 0x2b9   : > { %1238 = vmatpush3.msra.mxu1 %v767_v23 }
 0x2ba   : > { %1239 = vmatprep.subr.mxu1 %v1500_v0 }
 0x2bb   : > { %1240 = vmatpush3.msra.mxu1 %v766_v24 }
 0x2bc   : > { %1241 = vmatprep.subr.mxu1 %v1500_v0 }
 0x2bd   : > { %1242 = vmatpush3.msra.mxu1 %v765_v25 }
 0x2be   : > { %1243 = vmatprep.subr.mxu1 %v1500_v0 }
 0x2bf   : > { %1244 = vmatpush3.msra.mxu1 %v764_v26 }
 0x2c0   : > { %1245 = vmatprep.subr.mxu1 %v1500_v0 }
 0x2c1   : > { %1246 = vmatpush3.msra.mxu1 %v763_v27 }
 0x2c2   : > { %1247 = vmatprep.subr.mxu1 %v1500_v0 }
 0x2c3   : > { %1248 = vmatpush3.msra.mxu1 %v762_v28 }
 0x2c4   : > { %1249 = vmatprep.subr.mxu1 %v1500_v0 }
 0x2c5   : > { %1250 = vmatpush3.msra.mxu1 %v761_v29 }
 0x2c6   : > { %1251 = vmatprep.subr.mxu1 %v1500_v0 }
 0x2c7   : > { %1252 = vmatpush3.msra.mxu1 %v760_v30 }
 0x2c8   : > { %1253 = vmatprep.subr.mxu1 %v1500_v0 }
 0x2c9   : > { %1254 = vmatpush3.msra.mxu1 %v759_v31 }
 0x2ca   : > { %1255 = vmatprep.subr.mxu1 %v1500_v0 }
 0x2cb   : > { %1256 = vmatpush3.msra.mxu1 %v758_v32 }
 0x2cc   : > { %1257 = vmatprep.subr.mxu1 %v1500_v0 }
 0x2cd   : > { %1258 = vmatpush3.msra.mxu1 %v757_v33 }
 0x2ce   : > { %1259 = vmatprep.subr.mxu1 %v1500_v0 }
 0x2cf   : > { %1260 = vmatpush3.msra.mxu1 %v756_v34 }
 0x2d0   : > { %1261 = vmatprep.subr.mxu1 %v1500_v0 }
 0x2d1   : > { %1262 = vmatpush3.msra.mxu1 %v755_v40 }
 0x2d2   : > { %1263 = vmatprep.subr.mxu1 %v1500_v0 }
 0x2d3   : > { %1264 = vmatpush3.msra.mxu1 %v754_v41 }
 0x2d4   : > { %1265 = vmatprep.subr.mxu1 %v1500_v0 }
 0x2d5   : > { %1266 = vmatpush3.msra.mxu1 %v753_v42 }
 0x376   : > { %v651_v36 = vpop.f32.mrf.mxu1 }
 0x377   : > { %v652_v37 = vadd.f32 %v984_v35, %v651_v36 }
 0x378   : > { %v1199_v38 = vpop.f32.mrf.mxu1 }
 0x379   : > { %v655_v39 = vmax.f32 %v652_v37, 0.0 }
 0x37b   : > { %1233 = vmatmul.mubr.f32.vlgmr.msra.gmra.mxu0 %v655_v39 }
 0x43b   : > { %v747_v44 = vpop.f32.mrf.mxu0 }
 0x43c   : > { %v748_v45 = vadd.f32 %v986_v43, %v747_v44 }
 0x43d   : > { %v1234_v46 = vpop.f32.mrf.mxu0 }
 0x43e   : > { %v751_v47 = vmax.f32 %v748_v45, 0.0 }
 0x440   : > { %1268 = vmatmul.mubr.f32.vlgmr.msra.gmra.mxu1 %v751_v47 }
 0x500   : > { %v843_v49 = vpop.f32.mrf.mxu1 }
 0x501   : > { %v844_v50 = vadd.f32 %v988_v48, %v843_v49 }
 0x502   : > { %v1269_v0 = vpop.f32.mrf.mxu1 }
 0x503   : > { %v847_v52 = vmax.f32 %v844_v50, 0.0 }
 0x505   : > { %v857_v53 = vmul.f32 %v990_v51, %v847_v52 }
 0x507   : > { %858 = vadd.xlane.f32.xlu0 %v857_v53 }
 0x590   : > { %v859_v55 = vpop.xlane.xlu0 %858 }
 0x591   : > { %v866_v56 = vadd.f32 %v991_v54, %v859_v55 }
 0x593   : > { %868 = vst.msk [vmem:[%s281_s8] sm:$0xff] %vm867_vm2, %v866_v56 }
 0x594 PF: > { %p17_p8 = scmp.ge.s32.totalorder %s1602_s25, 6   ;;  %s1811_s18 = smov %s1484_s19 }
 0x595   : > { %s1812_s19 = smov %s1488_s20  ;;  %s1813_s20 = smov %s1612_s27 }
 0x596   : > { %s1814_s21 = smov %s1602_s25  ;;  %19 = sbr.rel (!%p17_p8) target bundleno = 5 (0x5), region = 102 }
 0x59b   :  { %888 = vsyncpa [#allocation3], 1 }
 0x59c   :  { %890 = vsyncpa [#allocation3 + $0x1], 1 }
 0x59d   :  { %891 = vsyncpa [#allocation5], 1 }
 0x59e   :  { %892 = vsyncpa [#allocation8], 1 }

</bundles_post_ra>
